<compile_context>
chip_gen: v5e
topology: v5e:2x2
jax: 0.10.0
libtpu: 0.0.40
codegen_flags: <defaults>
</compile_context>

<pallas_src>
import jax
import jax.numpy as jnp
from jax import lax
from jax.experimental import pallas as pl
from jax.experimental.pallas import tpu as pltpu


def _doble_conv_kernel(x_ref, w1_ref, b1_ref, w2_ref, b2_ref, o_ref, mid_ref):
    # x_ref  : (TH+4, W+2, Cin)   input tile, spatially pre-padded (2-row / 1-col halo)
    # w1_ref : (3, 3*Cin, Cmid)   b1_ref: (1, Cmid) f32
    # w2_ref : (3, 3*Cmid, Cout)  b2_ref: (1, Cout) f32
    # o_ref  : (TH, W, Cout)
    # mid_ref: (TH+2, W+2, Cmid)  VMEM scratch: ReLU(conv1) tile + 1-pixel zero halo
    TH, W, Cout = o_ref.shape
    Cin = x_ref.shape[-1]
    Cmid = mid_ref.shape[-1]
    cdt = mid_ref.dtype

    # ---- conv1 + bias + ReLU : TH+2 mid rows (output rows plus one halo row each side)
    m1 = (TH + 2) * W
    acc1 = jnp.broadcast_to(b1_ref[...], (m1, Cmid)).astype(jnp.float32)
    for kh in range(3):
        rows = x_ref[pl.ds(kh, TH + 2), :, :]                      # (TH+2, W+2, Cin)
        taps = jnp.concatenate(                                     # (TH+2, W, 3*Cin)
            [rows[:, 0:W, :], rows[:, 1:W + 1, :], rows[:, 2:W + 2, :]], axis=-1)
        acc1 = acc1 + jnp.dot(taps.reshape(m1, 3 * Cin), w1_ref[kh],
                              preferred_element_type=jnp.float32)
    mid = jnp.maximum(acc1, 0.0).reshape(TH + 2, W, Cmid).astype(cdt)

    # Store mid with zero side columns (conv2's padding=1 along W).
    zcol = jnp.zeros((TH + 2, 1, Cmid), cdt)
    mid_ref[...] = jnp.concatenate([zcol, mid, zcol], axis=1)

    # Halo rows that fall outside the image must be ZERO (conv2's padding=1 along H),
    # not conv1 evaluated over the input zero-padding.
    i = pl.program_id(1)

    @pl.when(i == 0)
    def _():
        mid_ref[0, :, :] = jnp.zeros((W + 2, Cmid), cdt)

    @pl.when(i == pl.num_programs(1) - 1)
    def _():
        mid_ref[TH + 1, :, :] = jnp.zeros((W + 2, Cmid), cdt)

    # ---- conv2 + bias + ReLU -> output tile
    m2 = TH * W
    acc2 = jnp.broadcast_to(b2_ref[...], (m2, Cout)).astype(jnp.float32)
    for kh in range(3):
        rows = mid_ref[pl.ds(kh, TH), :, :]                        # (TH, W+2, Cmid)
        taps = jnp.concatenate(
            [rows[:, 0:W, :], rows[:, 1:W + 1, :], rows[:, 2:W + 2, :]], axis=-1)
        acc2 = acc2 + jnp.dot(taps.reshape(m2, 3 * Cmid), w2_ref[kh],
                              preferred_element_type=jnp.float32)
    o_ref[...] = jnp.maximum(acc2, 0.0).reshape(TH, W, Cout).astype(o_ref.dtype)


def _fused_vmem_bytes(th, W, Cin, Cmid, Cout, isz):
    """Rough per-step VMEM footprint: double-buffered I/O + scratch + working values."""
    inp = (th + 4) * (W + 2) * Cin * isz
    out = th * W * Cout * 4
    mid = (th + 2) * (W + 2) * Cmid * isz
    work = ((th + 2) * W * (3 * Cin * isz + Cmid * 4)
            + th * W * (3 * Cmid * isz + Cout * 4))
    return 2 * (inp + out) + mid + work


def _choose_tile_h(H, W, Cin, Cmid, Cout, isz, budget_bytes=12 * 1024 * 1024):
    """Largest divisor of H whose fused working set fits a v7x-conservative VMEM budget."""
    for th in range(H, 0, -1):
        if H % th == 0 and _fused_vmem_bytes(th, W, Cin, Cmid, Cout, isz) <= budget_bytes:
            return th
    return 1


def doble_conv_forward(x_nchw, params, *, tile_h=None, compute_dtype=jnp.bfloat16):
    """Pallas implementation of DobleConv.forward (BN=False path)."""
    # TODO(synk): BatchNorm (BN=True) branch of the module is not implemented.
    x = jnp.transpose(x_nchw, (0, 2, 3, 1))                  # NCHW -> NHWC
    B, H, W, Cin = x.shape
    Cmid = params["w1"].shape[-1]
    Cout = params["w2"].shape[-1]
    isz = jnp.dtype(compute_dtype).itemsize

    th = tile_h if tile_h is not None else _choose_tile_h(H, W, Cin, Cmid, Cout, isz)
    if H % th != 0:
        raise ValueError(f"tile_h={th} must divide H={H}")
    n_h = H // th

    # Pad ONCE for both convs (2 rows / 1 col of zeros each side) and materialize the
    # overlapping H-tiles so the kernel input is a plain, auto-pipelined BlockSpec.
    # TODO(synk): halo duplication could be avoided with a manual in-kernel DMA
    # (memory_space=pl.ANY) at the cost of hand-rolled double buffering.
    x_pad = jnp.pad(x, ((0, 0), (2, 2), (1, 1), (0, 0)))
    x_tiles = jnp.stack(
        [x_pad[:, i * th: i * th + th + 4] for i in range(n_h)], axis=1
    ).astype(compute_dtype)                                   # (B, n_h, th+4, W+2, Cin)

    w1r = params["w1"].astype(compute_dtype).reshape(3, 3 * Cin, Cmid)
    w2r = params["w2"].astype(compute_dtype).reshape(3, 3 * Cmid, Cout)
    b1r = params["b1"].astype(jnp.float32).reshape(1, Cmid)
    b2r = params["b2"].astype(jnp.float32).reshape(1, Cout)

    out = pl.pallas_call(
        _doble_conv_kernel,
        out_shape=jax.ShapeDtypeStruct((B, H, W, Cout), x_nchw.dtype),
        grid_spec=pltpu.PrefetchScalarGridSpec(
            num_scalar_prefetch=0,
            grid=(B, n_h),
            in_specs=[
                pl.BlockSpec((None, None, th + 4, W + 2, Cin),
                             lambda b, i: (b, i, 0, 0, 0)),
                pl.BlockSpec((3, 3 * Cin, Cmid), lambda b, i: (0, 0, 0)),
                pl.BlockSpec((1, Cmid), lambda b, i: (0, 0)),
                pl.BlockSpec((3, 3 * Cmid, Cout), lambda b, i: (0, 0, 0)),
                pl.BlockSpec((1, Cout), lambda b, i: (0, 0)),
            ],
            out_specs=pl.BlockSpec((None, th, W, Cout), lambda b, i: (b, i, 0, 0)),
            scratch_shapes=[pltpu.VMEM((th + 2, W + 2, Cmid), compute_dtype)],
        ),
        compiler_params=pltpu.CompilerParams(
            dimension_semantics=("parallel", "parallel"),
            vmem_limit_bytes=64 * 1024 * 1024),
    )(x_tiles, w1r, b1r, w2r, b2r)
    return jnp.transpose(out, (0, 3, 1, 2))                   # NHWC -> NCHW


def init_params(key, in_channels, mid_channels, out_channels, dtype=jnp.float32):
    k1, k2, k3, k4 = jax.random.split(key, 4)
    # PyTorch Conv2d weight is (Cout, Cin, 3, 3); we store HWIO = (3, 3, Cin, Cout).
    w1 = jax.random.normal(k1, (3, 3, in_channels, mid_channels), dtype) * 0.1
    b1 = jax.random.normal(k2, (mid_channels,), dtype) * 0.1
    w2 = jax.random.normal(k3, (3, 3, mid_channels, out_channels), dtype) * 0.1
    b2 = jax.random.normal(k4, (out_channels,), dtype) * 0.1
    return {"w1": w1, "b1": b1, "w2": w2, "b2": b2}


def _reference_forward(x_nchw, params):
    """Pure-JAX f32 reference (same semantics as the PyTorch module, BN=False)."""
    x = jnp.transpose(x_nchw, (0, 2, 3, 1))
    for w, b in ((params["w1"], params["b1"]), (params["w2"], params["b2"])):
        x = lax.conv_general_dilated(
            x, w, window_strides=(1, 1), padding="SAME",
            dimension_numbers=("NHWC", "HWIO", "NHWC"))
        x = jnp.maximum(x + b[None, None, None, :], 0.0)
    return jnp.transpose(x, (0, 3, 1, 2))


if __name__ == "__main__":
    key = jax.random.PRNGKey(0)
    kx, kp = jax.random.split(key)

    B, Cin, Cmid, Cout, H, W = 2, 4, 8, 4, 16, 16
    x = jax.random.normal(kx, (B, Cin, H, W), jnp.float32)
    params = init_params(kp, Cin, Cmid, Cout)

    ref = jax.block_until_ready(_reference_forward(x, params))

    # tile_h=8 exercises the tiled path (2 H-tiles + halo masking); None -> auto (1 tile).
    # bf16 matmul inputs (f32 accumulation) => loosened tolerance vs the f32 reference.
    for th in (8, None):
        out = jax.block_until_ready(doble_conv_forward(x, params, tile_h=th))
        assert out.shape == (B, Cout, H, W), out.shape
        err = float(jnp.max(jnp.abs(out - ref)))
        assert jnp.allclose(out, ref, atol=5e-2, rtol=5e-2), err

    print("KERNEL_OK")
</pallas_src>

<mosaic_0001>
module attributes {stable_mosaic.version = 11 : i64} {
  func.func @_doble_conv_kernel(%arg0: i32, %arg1: i32, %arg2: memref<1x1x12x18x4xbf16, #tpu.memory_space<vmem>>, %arg3: memref<3x12x8xbf16, #tpu.memory_space<vmem>>, %arg4: memref<1x8xf32, #tpu.memory_space<vmem>>, %arg5: memref<3x24x4xbf16, #tpu.memory_space<vmem>>, %arg6: memref<1x4xf32, #tpu.memory_space<vmem>>, %arg7: memref<1x8x16x4xf32, #tpu.memory_space<vmem>>, %arg8: memref<10x18x8xbf16, #tpu.memory_space<vmem>>) attributes {dimension_semantics = [#tpu.dimension_semantics<parallel>, #tpu.dimension_semantics<parallel>], iteration_bounds = array<i64: 2, 2>, scalar_prefetch = 0 : i64, scratch_operands = 1 : i64, tpu.core_type = #tpu.core_type<tc>, window_params = [{transform_indices = @transform_0, window_bounds = array<i64: 1, 1, 12, 18, 4>}, {pipeline_mode = #tpu.pipeline_mode<synchronous>, transform_indices = @transform_1, window_bounds = array<i64: 3, 12, 8>}, {pipeline_mode = #tpu.pipeline_mode<synchronous>, transform_indices = @transform_2, window_bounds = array<i64: 1, 8>}, {pipeline_mode = #tpu.pipeline_mode<synchronous>, transform_indices = @transform_3, window_bounds = array<i64: 3, 24, 4>}, {pipeline_mode = #tpu.pipeline_mode<synchronous>, transform_indices = @transform_4, window_bounds = array<i64: 1, 4>}, {transform_indices = @transform_5, window_bounds = array<i64: 1, 8, 16, 4>}]} {
    %c0 = arith.constant 0 : index
    %c0_0 = arith.constant 0 : index
    %0 = vector.load %arg4[%c0, %c0_0] : memref<1x8xf32, #tpu.memory_space<vmem>>, vector<1x8xf32>
    %1 = vector.shape_cast %0 : vector<1x8xf32> to vector<1x8xf32>
    %2 = vector.broadcast %1 : vector<1x8xf32> to vector<160x8xf32>
    %c0_1 = arith.constant 0 : index
    %c0_2 = arith.constant 0 : index
    %c0_3 = arith.constant 0 : index
    %c0_4 = arith.constant 0 : index
    %c0_5 = arith.constant 0 : index
    %3 = vector.load %arg2[%c0_1, %c0_2, %c0_3, %c0_4, %c0_5] : memref<1x1x12x18x4xbf16, #tpu.memory_space<vmem>>, vector<1x1x10x18x4xbf16>
    %4 = vector.shape_cast %3 : vector<1x1x10x18x4xbf16> to vector<10x18x4xbf16>
    %5 = vector.extract_strided_slice %4 {offsets = [0, 0, 0], sizes = [10, 16, 4], strides = [1, 1, 1]} : vector<10x18x4xbf16> to vector<10x16x4xbf16>
    %6 = vector.extract_strided_slice %4 {offsets = [0, 1, 0], sizes = [10, 16, 4], strides = [1, 1, 1]} : vector<10x18x4xbf16> to vector<10x16x4xbf16>
    %7 = vector.extract_strided_slice %4 {offsets = [0, 2, 0], sizes = [10, 16, 4], strides = [1, 1, 1]} : vector<10x18x4xbf16> to vector<10x16x4xbf16>
    %8 = tpu.concatenate %5, %6, %7 in 2 : vector<10x16x4xbf16>, vector<10x16x4xbf16>, vector<10x16x4xbf16> -> vector<10x16x12xbf16>
    %9 = vector.shape_cast %8 : vector<10x16x12xbf16> to vector<160x12xbf16>
    %c0_6 = arith.constant 0 : index
    %c0_7 = arith.constant 0 : index
    %c0_8 = arith.constant 0 : index
    %10 = vector.load %arg3[%c0_6, %c0_7, %c0_8] : memref<3x12x8xbf16, #tpu.memory_space<vmem>>, vector<1x12x8xbf16>
    %11 = vector.shape_cast %10 : vector<1x12x8xbf16> to vector<12x8xbf16>
    %cst = arith.constant dense<0.000000e+00> : vector<160x8xf32>
    %12 = tpu.matmul %9, %11, %cst {dimension_numbers = #tpu.dot_dimension_numbers<[1], [0], [0], [1], [0, 0, 1, 1], [], []>} : vector<160x12xbf16>, vector<12x8xbf16>, vector<160x8xf32> -> vector<160x8xf32>
    %13 = arith.addf %2, %12 : vector<160x8xf32>
    %c0_9 = arith.constant 0 : index
    %c0_10 = arith.constant 0 : index
    %c1 = arith.constant 1 : index
    %c0_11 = arith.constant 0 : index
    %c0_12 = arith.constant 0 : index
    %14 = vector.load %arg2[%c0_9, %c0_10, %c1, %c0_11, %c0_12] : memref<1x1x12x18x4xbf16, #tpu.memory_space<vmem>>, vector<1x1x10x18x4xbf16>
    %15 = vector.shape_cast %14 : vector<1x1x10x18x4xbf16> to vector<10x18x4xbf16>
    %16 = vector.extract_strided_slice %15 {offsets = [0, 0, 0], sizes = [10, 16, 4], strides = [1, 1, 1]} : vector<10x18x4xbf16> to vector<10x16x4xbf16>
    %17 = vector.extract_strided_slice %15 {offsets = [0, 1, 0], sizes = [10, 16, 4], strides = [1, 1, 1]} : vector<10x18x4xbf16> to vector<10x16x4xbf16>
    %18 = vector.extract_strided_slice %15 {offsets = [0, 2, 0], sizes = [10, 16, 4], strides = [1, 1, 1]} : vector<10x18x4xbf16> to vector<10x16x4xbf16>
    %19 = tpu.concatenate %16, %17, %18 in 2 : vector<10x16x4xbf16>, vector<10x16x4xbf16>, vector<10x16x4xbf16> -> vector<10x16x12xbf16>
    %20 = vector.shape_cast %19 : vector<10x16x12xbf16> to vector<160x12xbf16>
    %c1_13 = arith.constant 1 : index
    %c0_14 = arith.constant 0 : index
    %c0_15 = arith.constant 0 : index
    %21 = vector.load %arg3[%c1_13, %c0_14, %c0_15] : memref<3x12x8xbf16, #tpu.memory_space<vmem>>, vector<1x12x8xbf16>
    %22 = vector.shape_cast %21 : vector<1x12x8xbf16> to vector<12x8xbf16>
    %cst_16 = arith.constant dense<0.000000e+00> : vector<160x8xf32>
    %23 = tpu.matmul %20, %22, %cst_16 {dimension_numbers = #tpu.dot_dimension_numbers<[1], [0], [0], [1], [0, 0, 1, 1], [], []>} : vector<160x12xbf16>, vector<12x8xbf16>, vector<160x8xf32> -> vector<160x8xf32>
    %24 = arith.addf %13, %23 : vector<160x8xf32>
    %c0_17 = arith.constant 0 : index
    %c0_18 = arith.constant 0 : index
    %c2 = arith.constant 2 : index
    %c0_19 = arith.constant 0 : index
    %c0_20 = arith.constant 0 : index
    %25 = vector.load %arg2[%c0_17, %c0_18, %c2, %c0_19, %c0_20] : memref<1x1x12x18x4xbf16, #tpu.memory_space<vmem>>, vector<1x1x10x18x4xbf16>
    %26 = vector.shape_cast %25 : vector<1x1x10x18x4xbf16> to vector<10x18x4xbf16>
    %27 = vector.extract_strided_slice %26 {offsets = [0, 0, 0], sizes = [10, 16, 4], strides = [1, 1, 1]} : vector<10x18x4xbf16> to vector<10x16x4xbf16>
    %28 = vector.extract_strided_slice %26 {offsets = [0, 1, 0], sizes = [10, 16, 4], strides = [1, 1, 1]} : vector<10x18x4xbf16> to vector<10x16x4xbf16>
    %29 = vector.extract_strided_slice %26 {offsets = [0, 2, 0], sizes = [10, 16, 4], strides = [1, 1, 1]} : vector<10x18x4xbf16> to vector<10x16x4xbf16>
    %30 = tpu.concatenate %27, %28, %29 in 2 : vector<10x16x4xbf16>, vector<10x16x4xbf16>, vector<10x16x4xbf16> -> vector<10x16x12xbf16>
    %31 = vector.shape_cast %30 : vector<10x16x12xbf16> to vector<160x12xbf16>
    %c2_21 = arith.constant 2 : index
    %c0_22 = arith.constant 0 : index
    %c0_23 = arith.constant 0 : index
    %32 = vector.load %arg3[%c2_21, %c0_22, %c0_23] : memref<3x12x8xbf16, #tpu.memory_space<vmem>>, vector<1x12x8xbf16>
    %33 = vector.shape_cast %32 : vector<1x12x8xbf16> to vector<12x8xbf16>
    %cst_24 = arith.constant dense<0.000000e+00> : vector<160x8xf32>
    %34 = tpu.matmul %31, %33, %cst_24 {dimension_numbers = #tpu.dot_dimension_numbers<[1], [0], [0], [1], [0, 0, 1, 1], [], []>} : vector<160x12xbf16>, vector<12x8xbf16>, vector<160x8xf32> -> vector<160x8xf32>
    %35 = arith.addf %24, %34 : vector<160x8xf32>
    %cst_25 = arith.constant 0.000000e+00 : f32
    %36 = vector.broadcast %cst_25 : f32 to vector<160x8xf32>
    %37 = arith.maximumf %35, %36 : vector<160x8xf32>
    %38 = vector.shape_cast %37 : vector<160x8xf32> to vector<10x16x8xf32>
    %39 = arith.truncf %38 : vector<10x16x8xf32> to vector<10x16x8xbf16>
    %cst_26 = arith.constant 0.000000e+00 : bf16
    %40 = vector.broadcast %cst_26 : bf16 to vector<10x1x8xbf16>
    %41 = tpu.concatenate %40, %39, %40 in 1 : vector<10x1x8xbf16>, vector<10x16x8xbf16>, vector<10x1x8xbf16> -> vector<10x18x8xbf16>
    %c0_27 = arith.constant 0 : index
    %c0_28 = arith.constant 0 : index
    %c0_29 = arith.constant 0 : index
    %42 = vector.load %arg8[%c0_27, %c0_28, %c0_29] : memref<10x18x8xbf16, #tpu.memory_space<vmem>>, vector<10x18x8xbf16>
    tpu.vector_store %arg8[%c0_27, %c0_28, %c0_29], %41 {strides = array<i32>} : memref<10x18x8xbf16, #tpu.memory_space<vmem>>, vector<10x18x8xbf16>,
    %c0_i32 = arith.constant 0 : i32
    %43 = arith.cmpi eq, %arg1, %c0_i32 : i32
    %44 = arith.extui %43 : i1 to i32
    %c0_i32_30 = arith.constant 0 : i32
    %45 = arith.cmpi ne, %44, %c0_i32_30 : i32
    scf.if %45 {
      %cst_60 = arith.constant 0.000000e+00 : bf16
      %88 = vector.broadcast %cst_60 : bf16 to vector<18x8xbf16>
      %c0_61 = arith.constant 0 : index
      %c0_62 = arith.constant 0 : index
      %c0_63 = arith.constant 0 : index
      %89 = vector.load %arg8[%c0_61, %c0_62, %c0_63] : memref<10x18x8xbf16, #tpu.memory_space<vmem>>, vector<1x18x8xbf16>
      %90 = vector.shape_cast %89 : vector<1x18x8xbf16> to vector<18x8xbf16>
      %91 = vector.shape_cast %88 : vector<18x8xbf16> to vector<1x18x8xbf16>
      tpu.vector_store %arg8[%c0_61, %c0_62, %c0_63], %91 {strides = array<i32>} : memref<10x18x8xbf16, #tpu.memory_space<vmem>>, vector<1x18x8xbf16>,
    } else {
    }
    %c1_i32 = arith.constant 1 : i32
    %46 = arith.cmpi eq, %arg1, %c1_i32 : i32
    %47 = arith.extui %46 : i1 to i32
    %c0_i32_31 = arith.constant 0 : i32
    %48 = arith.cmpi ne, %47, %c0_i32_31 : i32
    scf.if %48 {
      %cst_60 = arith.constant 0.000000e+00 : bf16
      %88 = vector.broadcast %cst_60 : bf16 to vector<18x8xbf16>
      %c9 = arith.constant 9 : index
      %c0_61 = arith.constant 0 : index
      %c0_62 = arith.constant 0 : index
      %89 = vector.load %arg8[%c9, %c0_61, %c0_62] : memref<10x18x8xbf16, #tpu.memory_space<vmem>>, vector<1x18x8xbf16>
      %90 = vector.shape_cast %89 : vector<1x18x8xbf16> to vector<18x8xbf16>
      %91 = vector.shape_cast %88 : vector<18x8xbf16> to vector<1x18x8xbf16>
      tpu.vector_store %arg8[%c9, %c0_61, %c0_62], %91 {strides = array<i32>} : memref<10x18x8xbf16, #tpu.memory_space<vmem>>, vector<1x18x8xbf16>,
    } else {
    }
    %c0_32 = arith.constant 0 : index
    %c0_33 = arith.constant 0 : index
    %49 = vector.load %arg6[%c0_32, %c0_33] : memref<1x4xf32, #tpu.memory_space<vmem>>, vector<1x4xf32>
    %50 = vector.shape_cast %49 : vector<1x4xf32> to vector<1x4xf32>
    %51 = vector.broadcast %50 : vector<1x4xf32> to vector<128x4xf32>
    %c0_34 = arith.constant 0 : index
    %c0_35 = arith.constant 0 : index
    %c0_36 = arith.constant 0 : index
    %52 = vector.load %arg8[%c0_34, %c0_35, %c0_36] : memref<10x18x8xbf16, #tpu.memory_space<vmem>>, vector<8x18x8xbf16>
    %53 = vector.extract_strided_slice %52 {offsets = [0, 0, 0], sizes = [8, 16, 8], strides = [1, 1, 1]} : vector<8x18x8xbf16> to vector<8x16x8xbf16>
    %54 = vector.extract_strided_slice %52 {offsets = [0, 1, 0], sizes = [8, 16, 8], strides = [1, 1, 1]} : vector<8x18x8xbf16> to vector<8x16x8xbf16>
    %55 = vector.extract_strided_slice %52 {offsets = [0, 2, 0], sizes = [8, 16, 8], strides = [1, 1, 1]} : vector<8x18x8xbf16> to vector<8x16x8xbf16>
    %56 = tpu.concatenate %53, %54, %55 in 2 : vector<8x16x8xbf16>, vector<8x16x8xbf16>, vector<8x16x8xbf16> -> vector<8x16x24xbf16>
    %57 = vector.shape_cast %56 : vector<8x16x24xbf16> to vector<128x24xbf16>
    %c0_37 = arith.constant 0 : index
    %c0_38 = arith.constant 0 : index
    %c0_39 = arith.constant 0 : index
    %58 = vector.load %arg5[%c0_37, %c0_38, %c0_39] : memref<3x24x4xbf16, #tpu.memory_space<vmem>>, vector<1x24x4xbf16>
    %59 = vector.shape_cast %58 : vector<1x24x4xbf16> to vector<24x4xbf16>
    %cst_40 = arith.constant dense<0.000000e+00> : vector<128x4xf32>
    %60 = tpu.matmul %57, %59, %cst_40 {dimension_numbers = #tpu.dot_dimension_numbers<[1], [0], [0], [1], [0, 0, 1, 1], [], []>} : vector<128x24xbf16>, vector<24x4xbf16>, vector<128x4xf32> -> vector<128x4xf32>
    %61 = arith.addf %51, %60 : vector<128x4xf32>
    %c1_41 = arith.constant 1 : index
    %c0_42 = arith.constant 0 : index
    %c0_43 = arith.constant 0 : index
    %62 = vector.load %arg8[%c1_41, %c0_42, %c0_43] : memref<10x18x8xbf16, #tpu.memory_space<vmem>>, vector<8x18x8xbf16>
    %63 = vector.extract_strided_slice %62 {offsets = [0, 0, 0], sizes = [8, 16, 8], strides = [1, 1, 1]} : vector<8x18x8xbf16> to vector<8x16x8xbf16>
    %64 = vector.extract_strided_slice %62 {offsets = [0, 1, 0], sizes = [8, 16, 8], strides = [1, 1, 1]} : vector<8x18x8xbf16> to vector<8x16x8xbf16>
    %65 = vector.extract_strided_slice %62 {offsets = [0, 2, 0], sizes = [8, 16, 8], strides = [1, 1, 1]} : vector<8x18x8xbf16> to vector<8x16x8xbf16>
    %66 = tpu.concatenate %63, %64, %65 in 2 : vector<8x16x8xbf16>, vector<8x16x8xbf16>, vector<8x16x8xbf16> -> vector<8x16x24xbf16>
    %67 = vector.shape_cast %66 : vector<8x16x24xbf16> to vector<128x24xbf16>
    %c1_44 = arith.constant 1 : index
    %c0_45 = arith.constant 0 : index
    %c0_46 = arith.constant 0 : index
    %68 = vector.load %arg5[%c1_44, %c0_45, %c0_46] : memref<3x24x4xbf16, #tpu.memory_space<vmem>>, vector<1x24x4xbf16>
    %69 = vector.shape_cast %68 : vector<1x24x4xbf16> to vector<24x4xbf16>
    %cst_47 = arith.constant dense<0.000000e+00> : vector<128x4xf32>
    %70 = tpu.matmul %67, %69, %cst_47 {dimension_numbers = #tpu.dot_dimension_numbers<[1], [0], [0], [1], [0, 0, 1, 1], [], []>} : vector<128x24xbf16>, vector<24x4xbf16>, vector<128x4xf32> -> vector<128x4xf32>
    %71 = arith.addf %61, %70 : vector<128x4xf32>
    %c2_48 = arith.constant 2 : index
    %c0_49 = arith.constant 0 : index
    %c0_50 = arith.constant 0 : index
    %72 = vector.load %arg8[%c2_48, %c0_49, %c0_50] : memref<10x18x8xbf16, #tpu.memory_space<vmem>>, vector<8x18x8xbf16>
    %73 = vector.extract_strided_slice %72 {offsets = [0, 0, 0], sizes = [8, 16, 8], strides = [1, 1, 1]} : vector<8x18x8xbf16> to vector<8x16x8xbf16>
    %74 = vector.extract_strided_slice %72 {offsets = [0, 1, 0], sizes = [8, 16, 8], strides = [1, 1, 1]} : vector<8x18x8xbf16> to vector<8x16x8xbf16>
    %75 = vector.extract_strided_slice %72 {offsets = [0, 2, 0], sizes = [8, 16, 8], strides = [1, 1, 1]} : vector<8x18x8xbf16> to vector<8x16x8xbf16>
    %76 = tpu.concatenate %73, %74, %75 in 2 : vector<8x16x8xbf16>, vector<8x16x8xbf16>, vector<8x16x8xbf16> -> vector<8x16x24xbf16>
    %77 = vector.shape_cast %76 : vector<8x16x24xbf16> to vector<128x24xbf16>
    %c2_51 = arith.constant 2 : index
    %c0_52 = arith.constant 0 : index
    %c0_53 = arith.constant 0 : index
    %78 = vector.load %arg5[%c2_51, %c0_52, %c0_53] : memref<3x24x4xbf16, #tpu.memory_space<vmem>>, vector<1x24x4xbf16>
    %79 = vector.shape_cast %78 : vector<1x24x4xbf16> to vector<24x4xbf16>
    %cst_54 = arith.constant dense<0.000000e+00> : vector<128x4xf32>
    %80 = tpu.matmul %77, %79, %cst_54 {dimension_numbers = #tpu.dot_dimension_numbers<[1], [0], [0], [1], [0, 0, 1, 1], [], []>} : vector<128x24xbf16>, vector<24x4xbf16>, vector<128x4xf32> -> vector<128x4xf32>
    %81 = arith.addf %71, %80 : vector<128x4xf32>
    %cst_55 = arith.constant 0.000000e+00 : f32
    %82 = vector.broadcast %cst_55 : f32 to vector<128x4xf32>
    %83 = arith.maximumf %81, %82 : vector<128x4xf32>
    %84 = vector.shape_cast %83 : vector<128x4xf32> to vector<8x16x4xf32>
    %c0_56 = arith.constant 0 : index
    %c0_57 = arith.constant 0 : index
    %c0_58 = arith.constant 0 : index
    %c0_59 = arith.constant 0 : index
    %85 = vector.load %arg7[%c0_56, %c0_57, %c0_58, %c0_59] : memref<1x8x16x4xf32, #tpu.memory_space<vmem>>, vector<1x8x16x4xf32>
    %86 = vector.shape_cast %85 : vector<1x8x16x4xf32> to vector<8x16x4xf32>
    %87 = vector.shape_cast %84 : vector<8x16x4xf32> to vector<1x8x16x4xf32>
    tpu.vector_store %arg7[%c0_56, %c0_57, %c0_58, %c0_59], %87 {strides = array<i32>} : memref<1x8x16x4xf32, #tpu.memory_space<vmem>>, vector<1x8x16x4xf32>,
    return
  }
  func.func @transform_0(%arg0: i32, %arg1: i32) -> (i32, i32, i32, i32, i32) {
    %c0_i32 = arith.constant 0 : i32
    %c0_i32_0 = arith.constant 0 : i32
    %c0_i32_1 = arith.constant 0 : i32
    %c0_i32_2 = arith.constant 0 : i32
    return %arg0, %arg1, %c0_i32, %c0_i32_0, %c0_i32_1 : i32, i32, i32, i32, i32
  }
  func.func @transform_1(%arg0: i32, %arg1: i32) -> (i32, i32, i32) {
    %c0_i32 = arith.constant 0 : i32
    %c0_i32_0 = arith.constant 0 : i32
    %c0_i32_1 = arith.constant 0 : i32
    %c0_i32_2 = arith.constant 0 : i32
    return %c0_i32, %c0_i32_0, %c0_i32_1 : i32, i32, i32
  }
  func.func @transform_2(%arg0: i32, %arg1: i32) -> (i32, i32) {
    %c0_i32 = arith.constant 0 : i32
    %c0_i32_0 = arith.constant 0 : i32
    %c0_i32_1 = arith.constant 0 : i32
    return %c0_i32, %c0_i32_0 : i32, i32
  }
  func.func @transform_3(%arg0: i32, %arg1: i32) -> (i32, i32, i32) {
    %c0_i32 = arith.constant 0 : i32
    %c0_i32_0 = arith.constant 0 : i32
    %c0_i32_1 = arith.constant 0 : i32
    %c0_i32_2 = arith.constant 0 : i32
    return %c0_i32, %c0_i32_0, %c0_i32_1 : i32, i32, i32
  }
  func.func @transform_4(%arg0: i32, %arg1: i32) -> (i32, i32) {
    %c0_i32 = arith.constant 0 : i32
    %c0_i32_0 = arith.constant 0 : i32
    %c0_i32_1 = arith.constant 0 : i32
    return %c0_i32, %c0_i32_0 : i32, i32
  }
  func.func @transform_5(%arg0: i32, %arg1: i32) -> (i32, i32, i32, i32) {
    %c0_i32 = arith.constant 0 : i32
    %c0_i32_0 = arith.constant 0 : i32
    %c0_i32_1 = arith.constant 0 : i32
    return %arg0, %arg1, %c0_i32, %c0_i32_0 : i32, i32, i32, i32
  }
}

</mosaic_0001>

<bundles_post_ra>
// kernel: tpu_custom_call.1
= control target key start
LH: loop header
LB: loop body
LE: loop exit
PB: predicated region body
PF: predicated region fallthrough
CT: control target
= control target key end

     0   :  { %s3797_s18 = smov 0   ;;  %s3799_s19 = smov 0   ;;  %s5071_s0 = inlined_call_operand.vmem [shape: bf16[2,2,12,18,4], index: 0, kind: input, shape index: {}]   ;;  %s5072_s1 = inlined_call_operand.vmem [shape: bf16[3,12,8], index: 1, kind: input, shape index: {}]   ;;  %s5073_s2 = inlined_call_operand.vmem [shape: f32[1,8], index: 2, kind: input, shape index: {}]   ;;  %s5074_s3 = inlined_call_operand.vmem [shape: bf16[3,24,4], index: 3, kind: input, shape index: {}]   ;;  %s5075_s4 = inlined_call_operand.vmem [shape: f32[1,4], index: 4, kind: input, shape index: {}]   ;;  %s5076_s5 = inlined_call_operand.vmem [shape: f32[2,16,16,4], index: 5, kind: output, shape index: {}]  }
   0x1   :  { %s3801_s20 = smov 0   ;;  %s3803_s21 = smov 0  }
   0x2   :  { %s3805_s22 = smov 0  }
   0x3 LB: > { %s24_s23 = sadd.s32 1, %s3752_s20  ;;  %s27_s24 = sadd.s32 1, %s3756_s21  ;;  %s3760_s22 = sphi %s3805_s22, %s15_s22   ;;  %s3756_s21 = sphi %s3803_s21, %s5082_s21   ;;  %s3752_s20 = sphi %s3801_s20, %s5081_s20   ;;  %s3748_s19 = sphi %s3799_s19, %s5080_s19   ;;  %s3744_s18 = sphi %s3797_s18, %s5079_s18  }
   0x4   : > { %p25_p0 = scmp.ge.s32.totalorder %s24_s23, 2  ;;  %p3236_p1 = scmp.ge.s32.totalorder %s3760_s22, 1 }
   0x5   : > { %p207_p2 = scmp.lt.s32.totalorder %s3760_s22, 5 }
   0x6   : > { %s5084_s23 = smov (%p25_p0, %s24_s23), 0  ;;  %s5086_s24 = smov (!%p25_p0, %s27_s24), %s3756_s21 }
   0x7   : > { %p208_p3 = pnand %p3236_p1, %p207_p2  ;;  %p29_p4 = scmp.ge.s32.totalorder %s5086_s24, 2 }
   0x8   : > { %p244_p5 = scmp.lt.s32.totalorder (!%p208_p3), %s3748_s19, 1  ;;  %p246_p6 = scmp.lt.s32.totalorder (!%p208_p3), %s3744_s18, 1 }
   0x9   : > { %s5088_s24 = smov (%p29_p4, %s5086_s24), 0  ;;  %211 = sbr.rel (%p208_p3) target bundleno = 1027 (0x403), region = 40 }
   0xa   : > { %s3238_s25 = sshll.u32 (!%p208_p3), %s3744_s18, 3  ;;  %s3762_s16 = smov (!%p208_p3), 4  }
   0xb   : > { %p256_p7 = scmp.lt.s32.totalorder (!%p208_p3), %s3238_s25, 15  ;;  %s3763_s17 = smov (!%p208_p3), 8  }
   0xc   : > { %p3468_p8 = scmp.ne.s32.totalorder (!%p208_p3), %s3744_s18, 0 }
   0xe   : > { %s5090_s19 = smov (!%p244_p5, %s3748_s19), 1  ;;  %s5092_s25 = smov (!%p256_p7, %s3238_s25), 15  ;;  %vm379_vm0 = vsmask.f32 7424  ;;  %vm520_vm1 = vcmask 1046528   ;;  %vm641_vm2 = vcmask 1045504  }
   0xf   : > { %s247_s26 = scalar_select %p246_p6, %s3744_s18, 1  ;;  %vm571_vm3 = vcmask 31744   ;;  %vm592_vm4 = vcmask 64512   ;;  %vm620_vm5 = vcmask 97280   ;;  %vm1806_vm6 = vcmask 1040384  }
  0x10   : > { %s3674_s27 = smul.u32 72, %s5090_s19  ;;  %s3240_s29 = sshll.u32 %s5090_s19, 5  ;;  %vm1807_vm7 = vsmask.f32 256  ;;  %vm1942_vm9 = vcmask 57344   ;;  %vm1939_vm10 = vcmask 60416  }
  0x11   : > { %s3673_s28 = smul.u32 36, %s247_s26  ;;  %s3239_s7 = sshll.u32 %s5092_s25, 1  ;;  %vm4437_vm8 = vmand %vm1806_vm6, %vm1807_vm7 }
  0x12   : > { %s260_s11 = sadd.s32 %s3240_s29, %s3239_s7 }
  0x13   : > { %s250_s30 = sadd.s32 %s3674_s27, %s3673_s28  ;;  %s3241_s12 = sshll.u32 %s260_s11, 3 }
  0x14   : > { %s3237_s6 = sshll.u32 %s250_s30, 2  ;;  %s3847_s15 = scalar_lea.vmem %s5076_s5, %s3241_s12 }
  0x15   : > { %s3835_s10 = scalar_lea.vmem %s5071_s0, %s3237_s6 }
  0x16   : > { %v3838_v0 = vld [vmem:[%s3835_s10 + $0x48] sm:$0xff]  ;;  %v289_v1 = vld [vmem:[%s3835_s10 + $0x50] sm:$0x1]  ;;  %v3842_v2 = vld [vmem:[%s3835_s10 + $0x54] sm:$0xff] }
  0x17   : > { %v365_v3 = vunpack.c.l.b16 %v289_v1  ;;  %v292_v4 = vld [vmem:[%s3835_s10 + $0x5c] sm:$0x1]  ;;  %v453_v5 = vshrl.u32 %v3838_v0, 16  ;;  %v455_v6 = vshll.u32 %v3838_v0, 16  ;;  %v465_v9 = vshrl.u32 %v3842_v2, 16  ;;  %v3856_v18 = vld [vmem:[%s3835_s10 + $0x6c] sm:$0xff] }
  0x18   : > { %v366_v7 = vunpack.c.l.b16 %v292_v4  ;;  %v467_v10 = vshll.u32 %v3842_v2, 16  ;;  %v298_v11 = vld [vmem:[%s3835_s10 + $0x74] sm:$0x1]  ;;  %v295_v20 = vld [vmem:[%s3835_s10 + $0x68] sm:$0x1]  ;;  %v3860_v23 = vld [vmem:[%s3835_s10 + $0x60] sm:$0xff] }
  0x19   : > { %v375_v8 = vpack.c.b16 %v365_v3, %v365_v3  ;;  %v457_v12 = vrot.slane %v455_v6, 1  ;;  %v368_v19 = vunpack.c.l.b16 %v298_v11  ;;  %v367_v26 = vunpack.c.l.b16 %v295_v20  ;;  %v3384_v42 = vld [vmem:[%s3835_s10 + $0x20] sm:$0x1]  ;;  %v3876_v47 = vld [vmem:[%s3835_s10 + $0x18] sm:$0xff]  ;;  %v3387_v52 = vld [vmem:[%s3835_s10 + $0x2c] sm:$0x1] }
  0x1a   : > { %v376_v13 = vpack.c.b16 %v366_v7, %v366_v7  ;;  %v469_v15 = vrot.slane %v467_v10, 1  ;;  %v539_v27 = vrot.slane %v3838_v0, 1  ;;  %v491_v30 = vshll.u32 %v3856_v18, 16  ;;  %v3886_v57 = vld [vmem:[%s3835_s10 + $0x24] sm:$0xff]  ;;  %v3298_v3 = vld [vmem:[%s3835_s10 + $0x14] sm:$0x1] }
  0x1b   : > { %v460_v14 = vshll.u32 %v375_v8, 16  ;;  %v458_v16 = vor.u32 %v457_v12, %v453_v5  ;;  %v378_v29 = vpack.c.b16 %v368_v19, %v368_v19  ;;  %v540_v31 = vrot.slane %v375_v8, 1 }
  0x1c   : > { %v472_v17 = vshll.u32 %v376_v13, 16  ;;  %v470_v22 = vor.u32 %v469_v15, %v465_v9  ;;  %v377_v32 = vpack.c.b16 %v367_v26, %v367_v26  ;;  %v477_v33 = vshrl.u32 %v3860_v23, 16 }
  0x1d   : > { %v462_v21 = vrot.slane %v460_v14, 1  ;;  %v479_v34 = vshll.u32 %v3860_v23, 16  ;;  %v542_v35 = vrot.slane %v3842_v2, 1  ;;  %v543_v36 = vrot.slane %v376_v13, 1 }
  0x1e   : > { %v474_v24 = vrot.slane %v472_v17, 1  ;;  %v484_v38 = vshll.u32 %v377_v32, 16  ;;  %v489_v39 = vshrl.u32 %v3856_v18, 16  ;;  %v493_v40 = vrot.slane %v491_v30, 1  ;;  %v3905_v17 = vld [vmem:[%s3835_s10 + $0xc] sm:$0xff] }
  0x1f   : > { %v463_v25 = vsel %vm379_vm0, %v458_v16, %v462_v21  ;;  %v481_v37 = vrot.slane %v479_v34, 1  ;;  %v496_v41 = vshll.u32 %v378_v29, 16  ;;  %v541_v43 = vsel %vm520_vm1, %v539_v27, %v540_v31  ;;  %v3301_v16 = vld [vmem:[%s3835_s10 + $0x20] sm:$0x1] }
  0x20   : > { %512 = vrot.lane.b32.xlu0 %v463_v25, %s3762_s16  ;;  %v475_v28 = vsel %vm379_vm0, %v470_v22, %v474_v24  ;;  %v486_v45 = vrot.slane %v484_v38, 1  ;;  %v544_v46 = vsel %vm520_vm1, %v542_v35, %v543_v36  ;;  %v1266_v48 = vunpack.c.l.b16 %v3384_v42  ;;  %v3910_v22 = vld [vmem:[%s3835_s10 + $0x18] sm:$0xff]  ;;  %v3921_v38 = vld [vmem:[%s3835_s10 + $0x24] sm:$0xff] }
  0x21   : > { %514 = vrot.lane.b32.xlu1 %v475_v28, %s3762_s16  ;;  %v482_v44 = vor.u32 %v481_v37, %v477_v33  ;;  %v494_v50 = vor.u32 %v493_v40, %v489_v39  ;;  %v498_v51 = vrot.slane %v496_v41, 1  ;;  %v545_v53 = vrot.slane %v3860_v23, 1 }
  0x22   : > { %v546_v54 = vrot.slane %v377_v32, 1  ;;  %v1289_v55 = vshll.u32 %v3876_v47, 16  ;;  %v1276_v56 = vpack.c.b16 %v1266_v48, %v1266_v48  ;;  %v1267_v59 = vunpack.c.l.b16 %v3387_v52 }
  0x23   : > { %v487_v49 = vsel %vm379_vm0, %v482_v44, %v486_v45  ;;  %v499_v58 = vsel %vm379_vm0, %v494_v50, %v498_v51  ;;  %v1287_v61 = vshrl.u32 %v3876_v47, 16  ;;  %v1301_v1 = vshll.u32 %v3886_v57, 16 }
  0x24   : > { %516 = vrot.lane.b32.xlu2 %v487_v49, %s3762_s16  ;;  %v547_v60 = vsel %vm520_vm1, %v545_v53, %v546_v54  ;;  %v1291_v62 = vrot.slane %v1289_v55, 1  ;;  %v1294_v63 = vshll.u32 %v1276_v56, 16  ;;  %v3894_v4 = vpack.c.b16 %v1267_v59, %v1267_v59 }
  0x25   : > { %v815_v5 = vunpack.c.l.b16 %v3298_v3  ;;  %v548_v6 = vrot.slane %v3856_v18, 1  ;;  %v549_v7 = vrot.slane %v378_v29, 1  ;;  %v1426_v8 = vrot.slane %v3876_v47, 1  ;;  %v3304_v29 = vld [vmem:[%s3835_s10 + $0x2c] sm:$0x1] }
  0x26   : > { %v1427_v9 = vrot.slane %v1276_v56, 1  ;;  %v1292_v10 = vor.u32 %v1291_v62, %v1287_v61  ;;  %v1296_v11 = vrot.slane %v1294_v63, 1  ;;  %v1299_v13 = vshrl.u32 %v3886_v57, 16  ;;  %v3393_v61 = vld [vmem:[%s3835_s10 + $0x44] sm:$0x1] }
  0x27   : > { %v550_v12 = vsel %vm520_vm1, %v548_v6, %v549_v7  ;;  %v1303_v14 = vrot.slane %v1301_v1, 1  ;;  %v1306_v15 = vshll.u32 %v3894_v4, 16  ;;  %v825_v19 = vpack.c.b16 %v815_v5, %v815_v5  ;;  %v3942_v1 = vld [vmem:[%s3835_s10 + $0x30] sm:$0xff]  ;;  %v3946_v6 = vld [vmem:[%s3835_s10 + $0x3c] sm:$0xff] }
  0x28   : > { %563 = vrot.lane.b32.xlu0 %v541_v43, %s3763_s17  ;;  %v1428_v20 = vsel %vm520_vm1, %v1426_v8, %v1427_v9  ;;  %v1297_v21 = vsel %vm379_vm0, %v1292_v10, %v1296_v11  ;;  %v816_v24 = vunpack.c.l.b16 %v3301_v16  ;;  %v975_v27 = vrot.slane %v3905_v17, 1  ;;  %v3396_v9 = vld [vmem:[%s3835_s10 + $0x50] sm:$0x1] }
  0x29   : > { %565 = vrot.lane.b32.xlu1 %v544_v46, %s3763_s17  ;;  %v1304_v25 = vor.u32 %v1303_v14, %v1299_v13  ;;  %v1308_v26 = vrot.slane %v1306_v15, 1  ;;  %v976_v28 = vrot.slane %v825_v19, 1  ;;  %v850_v30 = vshll.u32 %v3910_v22, 16  ;;  %v3390_v46 = vld [vmem:[%s3835_s10 + $0x38] sm:$0x1]  ;;  %v3956_v15 = vld [vmem:[%s3835_s10 + $0x48] sm:$0xff] }
  0x2a   : > { %v836_v31 = vshrl.u32 %v3905_v17, 16  ;;  %v838_v32 = vshll.u32 %v3905_v17, 16  ;;  %v843_v33 = vshll.u32 %v825_v19, 16  ;;  %v826_v34 = vpack.c.b16 %v816_v24, %v816_v24 }
  0x2b   : > { %v1309_v37 = vsel %vm379_vm0, %v1304_v25, %v1308_v26  ;;  %v817_v39 = vunpack.c.l.b16 %v3304_v29  ;;  %v977_v40 = vsel %vm520_vm1, %v975_v27, %v976_v28  ;;  %v848_v41 = vshrl.u32 %v3910_v22, 16  ;;  %v3307_v28 = vld [vmem:[%s3835_s10 + $0x38] sm:$0x1] }
  0x2c   : > { %567 = vrot.lane.b32.xlu2 %v547_v60, %s3763_s17  ;;  %v840_v35 = vrot.slane %v838_v32, 1  ;;  %v845_v36 = vrot.slane %v843_v33, 1  ;;  %v852_v42 = vrot.slane %v850_v30, 1  ;;  %v855_v43 = vshll.u32 %v826_v34, 16 }
  0x2d   : > { %v978_v48 = vrot.slane %v3910_v22, 1  ;;  %v3929_v49 = vpack.c.b16 %v817_v39, %v817_v39  ;;  %v862_v50 = vshll.u32 %v3921_v38, 16  ;;  %v979_v51 = vrot.slane %v826_v34, 1 }
  0x2e   : > { %v841_v44 = vor.u32 %v840_v35, %v836_v31  ;;  %v853_v52 = vor.u32 %v852_v42, %v848_v41  ;;  %v857_v53 = vrot.slane %v855_v43, 1  ;;  %v1268_v54 = vunpack.c.l.b16 %v3390_v46  ;;  %v271_v43 = vld [vmem:[%s3835_s10 + $0x8] sm:$0x1] }
  0x2f   : > { %v1429_v55 = vrot.slane %v3886_v57, 1  ;;  %v1430_v56 = vrot.slane %v3894_v4, 1  ;;  %v864_v59 = vrot.slane %v862_v50, 1  ;;  %v867_v60 = vshll.u32 %v3929_v49, 16 }
  0x30   : > { %518 = vrot.lane.b32.xlu0 %v499_v58, %s3762_s16  ;;  %v846_v45 = vsel %vm379_vm0, %v841_v44, %v845_v36  ;;  %v860_v58 = vshrl.u32 %v3921_v38, 16  ;;  %v980_v62 = vsel %vm520_vm1, %v978_v48, %v979_v51  ;;  %v858_v63 = vsel %vm379_vm0, %v853_v52, %v857_v53  ;;  %v3976_v48 = vld [vmem:[%s3835_s10 + $0x30] sm:$0xff]  ;;  %v3980_v51 = vld [vmem:[%s3835_s10] sm:$0xff] }
  0x31   : > { %569 = vrot.lane.b32.xlu1 %v550_v12, %s3763_s17  ;;  %v1278_v3 = vpack.c.b16 %v1268_v54, %v1268_v54  ;;  %v1431_v5 = vsel %vm520_vm1, %v1429_v55, %v1430_v56  ;;  %v1269_v4 = vunpack.c.l.b16 %v3393_v61  ;;  %v869_v8 = vrot.slane %v867_v60, 1  ;;  %v3399_v55 = vld [vmem:[%s3835_s10 + $0x5c] sm:$0x1]  ;;  %v3988_v61 = vld [vmem:[%s3835_s10 + $0x54] sm:$0xff] }
  0x32   : > { %v865_v7 = vor.u32 %v864_v59, %v860_v58  ;;  %v1432_v10 = vrot.slane %v3942_v1, 1  ;;  %v1325_v12 = vshll.u32 %v3946_v6, 16  ;;  %v1270_v16 = vunpack.c.l.b16 %v3396_v9  ;;  %v3310_v9 = vld [vmem:[%s3835_s10 + $0x44] sm:$0x1] }
  0x33   : > { %v1433_v11 = vrot.slane %v1278_v3, 1  ;;  %v1279_v13 = vpack.c.b16 %v1269_v4, %v1269_v4  ;;  %v1435_v25 = vrot.slane %v3946_v6, 1  ;;  %v1313_v27 = vshll.u32 %v3942_v1, 16 }
  0x34   : > { %1406 = vrot.lane.b32.xlu2 %v1297_v21, %s3762_s16  ;;  %v870_v14 = vsel %vm379_vm0, %v865_v7, %v869_v8  ;;  %v1327_v21 = vrot.slane %v1325_v12, 1  ;;  %v3964_v29 = vpack.c.b16 %v1270_v16, %v1270_v16  ;;  %v1337_v30 = vshll.u32 %v3956_v15, 16 }
  0x35   : > { %v1434_v19 = vsel %vm520_vm1, %v1432_v10, %v1433_v11  ;;  %v1330_v24 = vshll.u32 %v1279_v13, 16  ;;  %v1436_v26 = vrot.slane %v1279_v13, 1  ;;  %v1311_v31 = vshrl.u32 %v3942_v1, 16 }
  0x36   : > { %v1318_v32 = vshll.u32 %v1278_v3, 16  ;;  %v1315_v35 = vrot.slane %v1313_v27, 1  ;;  %v818_v36 = vunpack.c.l.b16 %v3307_v28  ;;  %v1339_v41 = vrot.slane %v1337_v30, 1  ;;  %v274_v27 = vld [vmem:[%s3835_s10 + $0x14] sm:$0x1]  ;;  %v4010_v30 = vld [vmem:[%s3835_s10 + $0x3c] sm:$0xff] }
  0x37   : > { %v1332_v34 = vrot.slane %v1330_v24, 1  ;;  %v1342_v42 = vshll.u32 %v3964_v29, 16  ;;  %v1437_v44 = vsel %vm520_vm1, %v1435_v25, %v1436_v26  ;;  %v359_v52 = vunpack.c.l.b16 %v271_v43 }
  0x38   : > { %1456 = vrot.lane.b32.xlu0 %v1428_v20, %s3763_s17  ;;  %v1323_v20 = vshrl.u32 %v3946_v6, 16  ;;  %v1316_v39 = vor.u32 %v1315_v35, %v1311_v31  ;;  %v828_v50 = vpack.c.b16 %v818_v36, %v818_v36  ;;  %v984_v56 = vrot.slane %v3976_v48, 1  ;;  %v3402_v36 = vld [vmem:[%s3835_s10 + $0x68] sm:$0x1] }
  0x39   : > { %955 = vrot.lane.b32.xlu1 %v846_v45, %s3762_s16  ;;  %v1344_v54 = vrot.slane %v1342_v42, 1  ;;  %v383_v59 = vshll.u32 %v3980_v51, 16  ;;  %v369_v60 = vpack.c.b16 %v359_v52, %v359_v52  ;;  %v1349_v8 = vshll.u32 %v3988_v61, 16  ;;  %v4026_v52 = vld [vmem:[%s3835_s10 + $0x60] sm:$0xff] }
  0x3a   : > { %v1328_v33 = vor.u32 %v1327_v21, %v1323_v20  ;;  %v985_v58 = vrot.slane %v828_v50, 1  ;;  %v521_v10 = vrot.slane %v3980_v51, 1  ;;  %v981_v12 = vrot.slane %v3921_v38, 1 }
  0x3b   : > { %v385_v4 = vrot.slane %v383_v59, 1  ;;  %v388_v7 = vshll.u32 %v369_v60, 16  ;;  %v982_v13 = vrot.slane %v3929_v49, 1  ;;  %v819_v20 = vunpack.c.l.b16 %v3310_v9 }
  0x3c   : > { %1005 = vrot.lane.b32.xlu2 %v977_v40, %s3763_s17  ;;  %v1335_v40 = vshrl.u32 %v3956_v15, 16  ;;  %v1333_v45 = vsel %vm379_vm0, %v1328_v33, %v1332_v34  ;;  %v986_v3 = vsel %vm520_vm1, %v984_v56, %v985_v58  ;;  %v1347_v24 = vshrl.u32 %v3988_v61, 16  ;;  %v4015_v33 = vld [vmem:[%s3835_s10 + $0xc] sm:$0xff] }
  0x3d   : > { %v983_v21 = vsel %vm520_vm1, %v981_v12, %v982_v13  ;;  %v1351_v25 = vrot.slane %v1349_v8, 1  ;;  %v4012_v31 = vpack.c.b16 %v819_v20, %v819_v20  ;;  %v360_v34 = vunpack.c.l.b16 %v274_v27  ;;  %v4046_v20 = vld [vmem:[%s3835_s10 + $0x48] sm:$0xff]  ;;  %v3284_v27 = vld [vmem:[%s5072_s1] sm:$0xf] }
  0x3e   : > { %v1340_v53 = vor.u32 %v1339_v41, %v1335_v40  ;;  %v879_v40 = vshll.u32 %v828_v50, 16  ;;  %v987_v41 = vrot.slane %v4010_v30, 1  ;;  %v395_v43 = vshll.u32 %v4015_v33, 16 }
  0x3f   : > { %v988_v42 = vrot.slane %v4012_v31, 1  ;;  %v393_v50 = vshrl.u32 %v4015_v33, 16 }
  0x40   : > { %1408 = vrot.lane.b32.xlu0 %v1309_v37, %s3762_s16  ;;  %v1320_v37 = vrot.slane %v1318_v32, 1  ;;  %v1352_v32 = vor.u32 %v1351_v25, %v1347_v24  ;;  %v397_v58 = vrot.slane %v395_v43, 1  ;;  %v884_v43 = vshrl.u32 %v4010_v30, 16 }
  0x41   : > { %1458 = vrot.lane.b32.xlu1 %v1431_v5, %s3763_s17  ;;  %v381_v5 = vshrl.u32 %v3980_v51, 16  ;;  %v989_v56 = vsel %vm520_vm1, %v987_v41, %v988_v42  ;;  %v3405_v41 = vld [vmem:[%s3835_s10 + $0x74] sm:$0x1] }
  0x42   : > { %v1321_v46 = vsel %vm379_vm0, %v1316_v39, %v1320_v37  ;;  %v872_v37 = vshrl.u32 %v3976_v48, 16  ;;  %v874_v39 = vshll.u32 %v3976_v48, 16  ;;  %v398_v8 = vor.u32 %v397_v58, %v393_v50  ;;  %v3370_v50 = vld [vmem:[%s5072_s1 + $0x8] sm:$0xf]  ;;  %v3631_v58 = vld [vmem:[%s5072_s1 + $0x8] sm:$0x30] }
  0x43   : > { %v386_v16 = vor.u32 %v385_v4, %v381_v5  ;;  %v524_v4 = vrot.slane %v4015_v33, 1 }
  0x44   : > { %957 = vrot.lane.b32.xlu2 %v858_v63, %s3762_s16  ;;  %v1271_v63 = vunpack.c.l.b16 %v3399_v55 }
  0x46   : > { %v3997_v11 = vpack.c.b16 %v1271_v63, %v1271_v63  ;;  %v1361_v63 = vshll.u32 %v4026_v52, 16 }
  0x48   : > { %1007 = vrot.lane.b32.xlu0 %v980_v62, %s3763_s17  ;;  %v1345_v62 = vsel %vm379_vm0, %v1340_v53, %v1344_v54  ;;  %v1354_v26 = vshll.u32 %v3997_v11, 16  ;;  %v1272_v53 = vunpack.c.l.b16 %v3402_v36  ;;  %v1363_v12 = vrot.slane %v1361_v63, 1 }
  0x49   : > { %1410 = vrot.lane.b32.xlu1 %v1321_v46, %s3762_s16  ;;  %v370_v46 = vpack.c.b16 %v360_v34, %v360_v34  ;;  %v4060_v34 = vld [vmem:[%s3835_s10 + $0x18] sm:$0xff]  ;;  %v990_v36 = vrot.slane %v4046_v20, 1 }
  0x4a   : > { %v1356_v35 = vrot.slane %v1354_v26, 1  ;;  %v407_v42 = vshll.u32 %v4060_v34, 16  ;;  %v405_v63 = vshrl.u32 %v4060_v34, 16 }
  0x4b   : > { %v400_v59 = vshll.u32 %v370_v46, 16 }
  0x4c   : > { %1460 = vrot.lane.b32.xlu2 %v1434_v19, %s3763_s17  ;;  %v390_v19 = vrot.slane %v388_v7, 1  ;;  %v1357_v54 = vsel %vm379_vm0, %v1352_v32, %v1356_v35  ;;  %v525_v7 = vrot.slane %v370_v46, 1 }
  0x4d   : > { %v402_v9 = vrot.slane %v400_v59, 1 }
  0x4e   : > { %v391_v49 = vsel %vm379_vm0, %v386_v16, %v390_v19  ;;  %v1439_v16 = vrot.slane %v3964_v29, 1  ;;  %v277_v19 = vld [vmem:[%s3835_s10 + $0x20] sm:$0x1]  ;;  %v526_v24 = vsel %vm520_vm1, %v524_v4, %v525_v7  ;;  %v3620_v29 = vld [vmem:[%s5072_s1] sm:$0x30] }
  0x4f   : > { %v403_v25 = vsel %vm379_vm0, %v398_v8, %v402_v9  ;;  %v361_v35 = vunpack.c.l.b16 %v277_v19  ;;  %v3316_v8 = vld [vmem:[%s3835_s10 + $0x5c] sm:$0x1]  ;;  %v527_v9 = vrot.slane %v4060_v34, 1 }
  0x50   : > { %959 = vrot.lane.b32.xlu0 %v870_v14, %s3762_s16  ;;  %v522_v14 = vrot.slane %v369_v60, 1  ;;  %v821_v19 = vunpack.c.l.b16 %v3316_v8 }
  0x51   : > { %1009 = vrot.lane.b32.xlu1 %v983_v21, %s3763_s17 }
  0x52   : > { %v523_v28 = vsel %vm520_vm1, %v521_v10, %v522_v14  ;;  %v1359_v10 = vshrl.u32 %v4026_v52, 16  ;;  %v1438_v14 = vrot.slane %v3956_v15, 1 }
  0x54   : > { %1412 = vrot.lane.b32.xlu2 %v1333_v45, %s3762_s16  ;;  %v881_v45 = vrot.slane %v879_v40, 1  ;;  %v1440_v26 = vsel %vm520_vm1, %v1438_v14, %v1439_v16  ;;  %v886_v40 = vshll.u32 %v4010_v30, 16 }
  0x58   : > { %1462 = vrot.lane.b32.xlu0 %v1437_v44, %s3763_s17  ;;  %v876_v44 = vrot.slane %v874_v39, 1 }
  0x5a   : > { %v877_v55 = vor.u32 %v876_v44, %v872_v37  ;;  %v888_v44 = vrot.slane %v886_v40, 1  ;;  %v4111_v40 = vld [vmem:[%s3835_s10 + $0x24] sm:$0xff] }
  0x5c   : > { %1011 = vrot.lane.b32.xlu2 %v986_v3, %s3763_s17  ;;  %v882_v60 = vsel %vm379_vm0, %v877_v55, %v881_v45  ;;  %v3313_v3 = vld [vmem:[%s3835_s10 + $0x50] sm:$0x1]  ;;  %v891_v45 = vshll.u32 %v4012_v31, 16  ;;  %v1273_v55 = vunpack.c.l.b16 %v3405_v41  ;;  %v889_v59 = vor.u32 %v888_v44, %v884_v43  ;;  %v3408_v44 = vld [vmem:[%s3835_s10 + $0x80] sm:$0x1] }
  0x5d   : > { %961 = vrot.lane.b32.xlu1 %v882_v60, %s3762_s16  ;;  %v820_v5 = vunpack.c.l.b16 %v3313_v3  ;;  %v3371_v31 = vor.u32 %v3631_v58, %v3370_v50  ;;  %v409_v3 = vrot.slane %v407_v42, 1  ;;  %v898_v43 = vshll.u32 %v4046_v20, 16 }
  0x5e   : > { %v893_v60 = vrot.slane %v891_v45, 1 }
  0x5f   : > { %v4048_v21 = vpack.c.b16 %v820_v5, %v820_v5  ;;  %v1094_v7 = vsel %vm641_vm2, %v3371_v31, 0  ;;  %v410_v14 = vor.u32 %v409_v3, %v405_v63  ;;  %v900_v50 = vrot.slane %v898_v43, 1  ;;  %v4127_v31 = vld [vmem:[%s3835_s10 + $0x78] sm:$0xff] }
  0x60   : > { %1414 = vrot.lane.b32.xlu0 %v1345_v62, %s3762_s16  ;;  %v4032_v62 = vpack.c.b16 %v1272_v53, %v1272_v53  ;;  %v371_v53 = vpack.c.b16 %v361_v35, %v361_v35  ;;  %v894_v4 = vsel %vm379_vm0, %v889_v59, %v893_v60  ;;  %v1274_v63 = vunpack.c.l.b16 %v3408_v44 }
  0x61   : > { %v991_v37 = vrot.slane %v4048_v21, 1  ;;  %v903_v58 = vshll.u32 %v4048_v21, 16  ;;  %v530_v21 = vrot.slane %v4111_v40, 1 }
  0x62   : > { %v1366_v13 = vshll.u32 %v4032_v62, 16  ;;  %v412_v5 = vshll.u32 %v371_v53, 16 }
  0x64   : > { %500 = vrot.lane.b32.xlu2 %v391_v49, %s3762_s16  ;;  %v1364_v49 = vor.u32 %v1363_v12, %v1359_v10  ;;  %v1368_v32 = vrot.slane %v1366_v13, 1  ;;  %v4091_v10 = vpack.c.b16 %v1273_v55, %v1273_v55  ;;  %v528_v13 = vrot.slane %v371_v53, 1 }
  0x65   : > { %1464 = vrot.lane.b32.xlu1 %v1440_v26, %s3763_s17  ;;  %v414_v16 = vrot.slane %v412_v5, 1  ;;  %v1442_v26 = vrot.slane %v3997_v11, 1  ;;  %v419_v53 = vshll.u32 %v4111_v40, 16  ;;  %v905_v5 = vrot.slane %v903_v58, 1 }
  0x66   : > { %v1369_v46 = vsel %vm379_vm0, %v1364_v49, %v1368_v32  ;;  %v280_v49 = vld [vmem:[%s3835_s10 + $0x2c] sm:$0x1]  ;;  %v529_v32 = vsel %vm520_vm1, %v527_v9, %v528_v13  ;;  %v3319_v13 = vld [vmem:[%s3835_s10 + $0x68] sm:$0x1] }
  0x67   : > { %v415_v35 = vsel %vm379_vm0, %v410_v14, %v414_v16  ;;  %v362_v11 = vunpack.c.l.b16 %v280_v49  ;;  %v421_v8 = vrot.slane %v419_v53, 1  ;;  %v4136_v14 = vpack.c.b16 %v1274_v63, %v1274_v63 }
  0x68   : > { %551 = vrot.lane.b32.xlu0 %v523_v28, %s3763_s17  ;;  %v3285_v28 = vor.u32 %v3620_v29, %v3284_v27  ;;  %v1385_v16 = vshll.u32 %v4127_v31, 16  ;;  %v1444_v49 = vrot.slane %v4026_v52, 1 }
  0x69   : > { %v372_v59 = vpack.c.b16 %v362_v11, %v362_v11  ;;  %v1390_v11 = vshll.u32 %v4136_v14, 16 }
  0x6a   : > { %v643_v39 = vsel %vm641_vm2, %v3285_v28, 0  ;;  %v1378_v28 = vshll.u32 %v4091_v10, 16 }
  0x6b   : > { %3670 = vmatpush.bf16.msra.mxu1 %v643_v39  ;;  %652 = vmatpush.bf16.msra.mxu0 %v643_v39  ;;  %v4108_v39 = vpack.c.b16 %v821_v19, %v821_v19  ;;  %v424_v9 = vshll.u32 %v372_v59, 16  ;;  %v531_v19 = vrot.slane %v372_v59, 1  ;;  %v1392_v58 = vrot.slane %v1390_v11, 1  ;;  %v3322_v11 = vld [vmem:[%s3835_s10 + $0x74] sm:$0x1] }
  0x6c   : > { %1013 = vrot.lane.b32.xlu2 %v989_v56, %s3763_s17  ;;  %v992_v56 = vsel %vm520_vm1, %v990_v36, %v991_v37  ;;  %v4106_v37 = vld [vmem:[%s3835_s10 + $0x54] sm:$0xff]  ;;  %v1380_v42 = vrot.slane %v1378_v28, 1 }
  0x6d   : > { %963 = vrot.lane.b32.xlu1 %v894_v4, %s3762_s16  ;;  %v993_v45 = vrot.slane %v4106_v37, 1  ;;  %v910_v59 = vshll.u32 %v4106_v37, 16 }
  0x6f   : > { %1103 = vmatpush.bf16.msrb.mxu1 %v1094_v7  ;;  %v417_v7 = vshrl.u32 %v4111_v40, 16 }
  0x70   : > { %1416 = vrot.lane.b32.xlu0 %v1357_v54, %s3762_s16  ;;  %v4075_v54 = vld [vmem:[%s3835_s10 + $0x6c] sm:$0xff] }
  0x71   : > { %v1373_v12 = vshll.u32 %v4075_v54, 16  ;;  %v1371_v27 = vshrl.u32 %v4075_v54, 16 }
  0x73   : > { %v1375_v29 = vrot.slane %v1373_v12, 1 }
  0x74   : > { %502 = vrot.lane.b32.xlu2 %v403_v25, %s3762_s16  ;;  %v1441_v25 = vrot.slane %v3988_v61, 1 }
  0x75   : > { %v1376_v41 = vor.u32 %v1375_v29, %v1371_v27  ;;  %v822_v27 = vunpack.c.l.b16 %v3319_v13  ;;  %v912_v13 = vrot.slane %v910_v59, 1 }
  0x76   : > { %v1443_v36 = vsel %vm520_vm1, %v1441_v25, %v1442_v26  ;;  %v422_v25 = vor.u32 %v421_v8, %v417_v7  ;;  %v426_v26 = vrot.slane %v424_v9, 1  ;;  %v4171_v8 = vld [vmem:[%s3835_s10 + $0x84] sm:$0xff] }
  0x77   : > { %1466 = vrot.lane.b32.xlu1 %v1443_v36, %s3763_s17  ;;  %v1381_v60 = vsel %vm379_vm0, %v1376_v41, %v1380_v42  ;;  %v1387_v36 = vrot.slane %v1385_v16, 1  ;;  %v283_v41 = vld [vmem:[%s3835_s10 + $0x38] sm:$0x1]  ;;  %v532_v42 = vsel %vm520_vm1, %v530_v21, %v531_v19  ;;  %v915_v21 = vshll.u32 %v4108_v39, 16 }
  0x78   : > { %553 = vrot.lane.b32.xlu0 %v526_v24, %s3763_s17  ;;  %v427_v43 = vsel %vm379_vm0, %v422_v25, %v426_v26 }
  0x7c   : > { %1015 = vrot.lane.b32.xlu2 %v992_v56, %s3763_s17  ;;  %v896_v56 = vshrl.u32 %v4046_v20, 16 }
  0x7e   : > { %v4095_v24 = vpop.permute.xlu2 %516  ;;  %v901_v3 = vor.u32 %v900_v50, %v896_v56  ;;  %v363_v56 = vunpack.c.l.b16 %v283_v41 }
  0x80   : > { %1418 = vrot.lane.b32.xlu0 %v1369_v46, %s3762_s16  ;;  %v994_v46 = vrot.slane %v4108_v39, 1  ;;  %v906_v12 = vsel %vm379_vm0, %v901_v3, %v905_v5  ;;  %v373_v19 = vpack.c.b16 %v363_v56, %v363_v56 }
  0x81   : > { %965 = vrot.lane.b32.xlu1 %v906_v12, %s3762_s16  ;;  %v908_v12 = vshrl.u32 %v4106_v37, 16 }
  0x82   : > { %v995_v4 = vsel %vm520_vm1, %v993_v45, %v994_v46  ;;  %v4151_v45 = vld [vmem:[%s3835_s10 + $0x60] sm:$0xff]  ;;  %v4153_v46 = vpack.c.b16 %v822_v27, %v822_v27  ;;  %v917_v27 = vrot.slane %v915_v21, 1 }
  0x83   : > { %v996_v63 = vrot.slane %v4151_v45, 1  ;;  %v286_v21 = vld [vmem:[%s3835_s10 + $0x44] sm:$0x1] }
  0x84   : > { %504 = vrot.lane.b32.xlu2 %v415_v35, %s3762_s16  ;;  %v1383_v35 = vshrl.u32 %v4127_v31, 16  ;;  %v997_v3 = vrot.slane %v4153_v46, 1 }
  0x86   : > { %v4121_v55 = vpop.permute.xlu2 %567  ;;  %v1388_v50 = vor.u32 %v1387_v36, %v1383_v35  ;;  %v436_v35 = vshll.u32 %v373_v19, 16  ;;  %v1397_v36 = vshll.u32 %v4171_v8, 16 }
  0x88   : > { %555 = vrot.lane.b32.xlu0 %v529_v32, %s3763_s17  ;;  %v1445_v32 = vrot.slane %v4032_v62, 1  ;;  %v4158_v62 = vld [vmem:[%s3835_s10 + $0x30] sm:$0xff]  ;;  %v1393_v25 = vsel %vm379_vm0, %v1388_v50, %v1392_v58  ;;  %v438_v50 = vrot.slane %v436_v35, 1  ;;  %v823_v58 = vunpack.c.l.b16 %v3322_v11 }
  0x89   : > { %v431_v5 = vshll.u32 %v4158_v62, 16  ;;  %v533_v41 = vrot.slane %v4158_v62, 1  ;;  %v922_v11 = vshll.u32 %v4151_v45, 16 }
  0x8a   : > { %v1446_v44 = vsel %vm520_vm1, %v1444_v49, %v1445_v32  ;;  %v429_v49 = vshrl.u32 %v4158_v62, 16 }
  0x8b   : > { %1468 = vrot.lane.b32.xlu1 %v1446_v44, %s3763_s17  ;;  %v433_v32 = vrot.slane %v431_v5, 1  ;;  %v534_v44 = vrot.slane %v373_v19, 1  ;;  %v1447_v5 = vrot.slane %v4075_v54, 1 }
  0x8c   : > { %1017 = vrot.lane.b32.xlu2 %v995_v4, %s3763_s17 }
  0x8d   : > { %v434_v56 = vor.u32 %v433_v32, %v429_v49  ;;  %v535_v19 = vsel %vm520_vm1, %v533_v41, %v534_v44  ;;  %v4216_v49 = vld [vmem:[%s3835_s10 + $0x3c] sm:$0xff]  ;;  %v364_v32 = vunpack.c.l.b16 %v286_v21 }
  0x8e   : > { %v4140_v28 = vpop.permute.xlu2 %1406  ;;  %v441_v21 = vshrl.u32 %v4216_v49, 16 }
  0x90   : > { %1420 = vrot.lane.b32.xlu0 %v1381_v60, %s3762_s16  ;;  %v3411_v60 = vld [vmem:[%s3835_s10 + $0x8c] sm:$0x1] }
  0x91   : > { %v1275_v26 = vunpack.c.l.b16 %v3411_v60  ;;  %v1395_v60 = vshrl.u32 %v4171_v8, 16 }
  0x92   : > { %v513_v29 = vpop.permute.xlu0 %512 }
  0x93   : > { %v4155_v53 = vpop.permute.xlu1 %514  ;;  %v585_v4 = vsel %vm571_vm3, %v3838_v0, %v513_v29  ;;  %v913_v0 = vor.u32 %v912_v13, %v908_v12  ;;  %v998_v29 = vsel %vm520_vm1, %v996_v63, %v997_v3  ;;  %v1399_v63 = vrot.slane %v1397_v36, 1  ;;  %v3642_v12 = vld [vmem:[%s5072_s1 + $0x10] sm:$0x30] }
  0x94   : > { %506 = vrot.lane.b32.xlu2 %v427_v43, %s3762_s16  ;;  %v587_v35 = vsel %vm571_vm3, %v3842_v2, %v4155_v53  ;;  %v1477_v36 = vsel %vm571_vm3, %v3876_v47, %v4140_v28  ;;  %v927_v47 = vshll.u32 %v4153_v46, 16 }
  0x95   : > { %v918_v39 = vsel %vm379_vm0, %v913_v0, %v917_v27  ;;  %v4210_v0 = vld [vmem:[%s3835_s10 + $0x6c] sm:$0xff] }
  0x96   : > { %v4173_v9 = vpop.permute.xlu2 %1005  ;;  %967 = vrot.lane.b32.xlu1 %v918_v39, %s3762_s16  ;;  %v999_v41 = vrot.slane %v4210_v0, 1 }
  0x98   : > { %557 = vrot.lane.b32.xlu0 %v532_v42, %s3763_s17  ;;  %v4188_v42 = vpack.c.b16 %v1275_v26, %v1275_v26 }
  0x9a   : > { %v564_v7 = vpop.permute.xlu0 %563  ;;  %v1402_v13 = vshll.u32 %v4188_v42, 16 }
  0x9b   : > { %v606_v16 = vsel %vm592_vm4, %v585_v4, %v564_v7  ;;  %v566_v43 = vpop.permute.xlu1 %565  ;;  %v1448_v4 = vrot.slane %v4091_v10, 1  ;;  %v3456_v7 = vld [vmem:[%s5072_s1 + $0x10] sm:$0xf]  ;;  %v4212_v10 = vpack.c.b16 %v823_v58, %v823_v58  ;;  %v920_v58 = vshrl.u32 %v4151_v45, 16 }
  0x9c   : > { %3292 = vmatmul.msk.bf16.vlgmr.msra.gmra.mxu1 %vm620_vm5, %v606_v16  ;;  %1019 = vrot.lane.b32.xlu2 %v998_v29, %s3763_s17  ;;  %v3457_v16 = vor.u32 %v3642_v12, %v3456_v7  ;;  %v1400_v29 = vor.u32 %v1399_v63, %v1395_v60  ;;  %v1404_v39 = vrot.slane %v1402_v13, 1  ;;  %v924_v60 = vrot.slane %v922_v11, 1 }
  0x9d   : > { %v1449_v26 = vsel %vm520_vm1, %v1447_v5, %v1448_v4  ;;  %v1000_v44 = vrot.slane %v4212_v10, 1  ;;  %v608_v28 = vsel %vm592_vm4, %v587_v35, %v566_v43  ;;  %v374_v63 = vpack.c.b16 %v364_v32, %v364_v32 }
  0x9e   : > { %v4194_v3 = vpop.permute.xlu2 %957  ;;  %v1545_v27 = vsel %vm641_vm2, %v3457_v16, 0  ;;  %1470 = vrot.lane.b32.xlu1 %v1449_v26, %s3763_s17  ;;  %v1405_v4 = vsel %vm379_vm0, %v1400_v29, %v1404_v39  ;;  %v925_v7 = vor.u32 %v924_v60, %v920_v58  ;;  %v929_v12 = vrot.slane %v927_v47, 1 }
  0x9f   : > { %1554 = vmatpush.bf16.msra.mxu2 %v1545_v27  ;;  %v1001_v13 = vsel %vm520_vm1, %v999_v41, %v1000_v44  ;;  %v536_v43 = vrot.slane %v4216_v49, 1  ;;  %v1451_v39 = vrot.slane %v4136_v14, 1  ;;  %v932_v47 = vshrl.u32 %v4210_v0, 16 }
  0xa0   : > { %1422 = vrot.lane.b32.xlu0 %v1393_v25, %s3762_s16  ;;  %v439_v25 = vsel %vm379_vm0, %v434_v56, %v438_v50  ;;  %v443_v50 = vshll.u32 %v4216_v49, 16  ;;  %v930_v46 = vsel %vm379_vm0, %v925_v7, %v929_v12 }
  0xa2   : > { %v4191_v59 = vpop.permute.xlu0 %518  ;;  %v445_v16 = vrot.slane %v443_v50, 1  ;;  %v589_v50 = vsel %vm571_vm3, %v3860_v23, %v4095_v24 }
  0xa3   : > { %v4230_v56 = vpop.permute.xlu1 %569  ;;  %v610_v23 = vsel %vm592_vm4, %v589_v50, %v4121_v55  ;;  %v1453_v55 = vrot.slane %v4171_v8, 1 }
  0xa4   : > { %508 = vrot.lane.b32.xlu2 %v439_v25, %s3762_s16  ;;  %v537_v25 = vrot.slane %v374_v63, 1  ;;  %v446_v26 = vor.u32 %v445_v16, %v441_v21  ;;  %v591_v16 = vsel %vm571_vm3, %v3856_v18, %v4191_v59  ;;  %v3325_v18 = vld [vmem:[%s3835_s10 + $0x80] sm:$0x1]  ;;  %v4295_v59 = vld [vmem:[%s3835_s10 + $0x78] sm:$0xff] }
  0xa6   : > { %v4233_v53 = vpop.permute.xlu2 %1460  ;;  %969 = vrot.lane.b32.xlu1 %v930_v46, %s3762_s16  ;;  %v538_v11 = vsel %vm520_vm1, %v536_v43, %v537_v25  ;;  %v612_v46 = vsel %vm592_vm4, %v591_v16, %v4230_v56  ;;  %v946_v56 = vshll.u32 %v4295_v59, 16 }
  0xa8   : > { %559 = vrot.lane.b32.xlu0 %v535_v19, %s3763_s17  ;;  %v448_v19 = vshll.u32 %v374_v63, 16  ;;  %v939_v63 = vshll.u32 %v4212_v10, 16 }
  0xaa   : > { %v1457_v2 = vpop.permute.xlu0 %1456  ;;  %v450_v27 = vrot.slane %v448_v19, 1  ;;  %v941_v7 = vrot.slane %v939_v63, 1 }
  0xab   : > { %v1497_v5 = vsel %vm592_vm4, %v1477_v36, %v1457_v2  ;;  %v956_v35 = vpop.permute.xlu1 %955  ;;  %v1450_v36 = vrot.slane %v4127_v31, 1  ;;  %v934_v2 = vshll.u32 %v4210_v0, 16 }
  0xac   : > { %3293 = vmatmul.msk.bf16.gmra.mxu1 %vm620_vm5, %v608_v28  ;;  %3458 = vmatmul.msk.bf16.vlgmr.msra.gmra.mxu2 %vm620_vm5, %v1497_v5  ;;  %v451_v41 = vsel %vm379_vm0, %v446_v26, %v450_v27  ;;  %v824_v27 = vunpack.c.l.b16 %v3325_v18  ;;  %v1026_v50 = vsel %vm571_vm3, %v3905_v17, %v956_v35 }
  0xad   : > { %1021 = vrot.lane.b32.xlu2 %v1001_v13, %s3763_s17  ;;  %v1452_v44 = vsel %vm520_vm1, %v1450_v36, %v1451_v39  ;;  %v936_v28 = vrot.slane %v934_v2, 1  ;;  %v1454_v13 = vrot.slane %v4188_v42, 1  ;;  %v948_v39 = vrot.slane %v946_v56, 1 }
  0xae   : > { %v1413_v32 = vpop.permute.xlu2 %1412  ;;  %1472 = vrot.lane.b32.xlu1 %v1452_v44, %s3763_s17  ;;  %v1046_v63 = vsel %vm592_vm4, %v1026_v50, %v4173_v9 }
  0xaf   : > { %v1455_v21 = vsel %vm520_vm1, %v1453_v55, %v1454_v13 }
  0xb0   : > { %1424 = vrot.lane.b32.xlu0 %v1405_v4, %s3762_s16  ;;  %v937_v4 = vor.u32 %v936_v28, %v932_v47 }
  0xb2   : > { %v1409_v29 = vpop.permute.xlu0 %1408 }
  0xb3   : > { %v1479_v14 = vsel %vm571_vm3, %v3886_v57, %v1409_v29  ;;  %v1459_v24 = vpop.permute.xlu1 %1458  ;;  %v942_v57 = vsel %vm379_vm0, %v937_v4, %v941_v7  ;;  %v834_v29 = vpack.c.b16 %v824_v27, %v824_v27 }
  0xb4   : > { %v1499_v5 = vsel %vm592_vm4, %v1479_v14, %v1459_v24  ;;  %v1483_v14 = vsel %vm571_vm3, %v3946_v6, %v1413_v32 }
  0xb5   : > { %510 = vrot.lane.b32.xlu2 %v451_v41, %s3762_s16 }
  0xb6   : > { %v4263_v60 = vpop.permute.xlu2 %1011  ;;  %971 = vrot.lane.b32.xlu1 %v942_v57, %s3762_s16 }
  0xb8   : > { %561 = vrot.lane.b32.xlu0 %v538_v11, %s3763_s17  ;;  %v951_v11 = vshll.u32 %v834_v29, 16 }
  0xba   : > { %v1008_v58 = vpop.permute.xlu0 %1007 }
  0xbb   : > { %v1411_v19 = vpop.permute.xlu1 %1410 }
  0xbc   : > { %3294 = vmatmul.msk.bf16.gmra.mxu1 %vm620_vm5, %v610_v23  ;;  %3459 = vmatmul.msk.bf16.gmra.mxu2 %vm620_vm5, %v1499_v5  ;;  %v1481_v43 = vsel %vm571_vm3, %v3942_v1, %v1411_v19  ;;  %v944_v1 = vshrl.u32 %v4295_v59, 16 }
  0xbd   : > { %v1501_v26 = vsel %vm592_vm4, %v1481_v43, %v4233_v53  ;;  %v953_v53 = vrot.slane %v951_v11, 1 }
  0xbe   : > { %v501_v10 = vpop.permute.xlu2 %500  ;;  %1474 = vrot.lane.b32.xlu1 %v1455_v21, %s3763_s17  ;;  %v949_v41 = vor.u32 %v948_v39, %v944_v1 }
  0xbf   : > { %v573_v28 = vsel %vm571_vm3, %v3980_v51, %v501_v10  ;;  %v1028_v51 = vsel %vm571_vm3, %v3910_v22, %v4194_v3  ;;  %v1002_v22 = vrot.slane %v4295_v59, 1  ;;  %v1003_v3 = vrot.slane %v834_v29, 1 }
  0xc0   : > { %v954_v2 = vsel %vm379_vm0, %v949_v41, %v953_v53  ;;  %v1048_v4 = vsel %vm592_vm4, %v1028_v51, %v1008_v58 }
  0xc2   : > { %v4274_v12 = vpop.permute.xlu0 %959 }
  0xc3   : > { %v1010_v47 = vpop.permute.xlu1 %1009  ;;  %v1030_v16 = vsel %vm571_vm3, %v3921_v38, %v4274_v12 }
  0xc4   : > { %v1050_v43 = vsel %vm592_vm4, %v1030_v16, %v1010_v47 }
  0xc6   : > { %v4289_v42 = vpop.permute.xlu2 %1013  ;;  %973 = vrot.lane.b32.xlu1 %v954_v2, %s3762_s16 }
  0xca   : > { %v1463_v25 = vpop.permute.xlu0 %1462 }
  0xcb   : > { %v1503_v24 = vsel %vm592_vm4, %v1483_v14, %v1463_v25 }
  0xcc   : > { %3295 = vmatmul.msk.bf16.gmra.mxu1 %vm620_vm5, %v612_v46  ;;  %3460 = vmatmul.msk.bf16.gmra.mxu2 %vm620_vm5, %v1501_v26 }
  0xce   : > { %v503_v44 = vpop.permute.xlu2 %502 }
  0xcf   : > { %v962_v6 = vpop.permute.xlu1 %961  ;;  %v575_v35 = vsel %vm571_vm3, %v4015_v33, %v503_v44 }
  0xd2   : > { %v1415_v36 = vpop.permute.xlu0 %1414 }
  0xd3   : > { %v1485_v9 = vsel %vm571_vm3, %v3956_v15, %v1415_v36  ;;  %v1004_v15 = vsel %vm520_vm1, %v1002_v22, %v1003_v3 }
  0xd4   : > { %1023 = vrot.lane.b32.xlu2 %v1004_v15, %s3763_s17 }
  0xd6   : > { %v4314_v17 = vpop.permute.xlu2 %1015 }
  0xd7   : > { %v1465_v57 = vpop.permute.xlu1 %1464 }
  0xd8   : > { %v1505_v55 = vsel %vm592_vm4, %v1485_v9, %v1465_v57 }
  0xda   : > { %v552_v23 = vpop.permute.xlu0 %551 }
  0xdb   : > { %v594_v5 = vsel %vm592_vm4, %v573_v28, %v552_v23 }
  0xdc   : > { %3286 = vmatmul.msk.bf16.vlgmr.msra.gmra.mxu0 %vm620_vm5, %v594_v5  ;;  %3372 = vmatmul.msk.bf16.vlgmr.msrb.gmra.mxu1 %vm620_vm5, %v1046_v63 }
  0xdd   : > { %3461 = vmatmul.msk.bf16.gmra.mxu2 %vm620_vm5, %v1503_v24 }
  0xde   : > { %v505_v7 = vpop.permute.xlu2 %504 }
  0xdf   : > { %v964_v33 = vpop.permute.xlu1 %963  ;;  %v577_v46 = vsel %vm571_vm3, %v4060_v34, %v505_v7  ;;  %v1032_v34 = vsel %vm571_vm3, %v3976_v48, %v962_v6 }
  0xe0   : > { %v1052_v1 = vsel %vm592_vm4, %v1032_v34, %v4263_v60 }
  0xe2   : > { %v1417_v32 = vpop.permute.xlu0 %1416 }
  0xe3   : > { %v1487_v19 = vsel %vm571_vm3, %v3988_v61, %v1417_v32 }
  0xe6   : > { %v4332_v21 = vpop.permute.xlu2 %1017 }
  0xe9   : > { %v1467_v25 = vpop.permute.xlu1 %1466 }
  0xea   : > { %v554_v10 = vpop.permute.xlu0 %553  ;;  %v1507_v18 = vsel %vm592_vm4, %v1487_v19, %v1467_v25 }
  0xeb   : > { %v596_v13 = vsel %vm592_vm4, %v575_v35, %v554_v10 }
  0xec   : > { %3287 = vmatmul.msk.bf16.gmra.mxu0 %vm620_vm5, %v596_v13  ;;  %3373 = vmatmul.msk.bf16.gmra.mxu1 %vm620_vm5, %v1048_v4 }
  0xed   : > { %3462 = vmatmul.msk.bf16.gmra.mxu2 %vm620_vm5, %v1505_v55 }
  0xee   : > { %v507_v29 = vpop.permute.xlu2 %506 }
  0xef   : > { %v579_v36 = vsel %vm571_vm3, %v4111_v40, %v507_v29  ;;  %v1034_v40 = vsel %vm571_vm3, %v4010_v30, %v964_v33 }
  0xf0   : > { %v1054_v14 = vsel %vm592_vm4, %v1034_v40, %v4289_v42 }
  0xf2   : > { %v1419_v58 = vpop.permute.xlu0 %1418 }
  0xf3   : > { %v966_v38 = vpop.permute.xlu1 %965  ;;  %v1489_v12 = vsel %vm571_vm3, %v4026_v52, %v1419_v58 }
  0xf4   : > { %v1036_v42 = vsel %vm571_vm3, %v4046_v20, %v966_v38 }
  0xf5   : > { %v1056_v9 = vsel %vm592_vm4, %v1036_v42, %v4314_v17 }
  0xf6   : > { %v1020_v56 = vpop.permute.xlu2 %1019 }
  0xfa   : > { %v556_v26 = vpop.permute.xlu0 %555 }
  0xfb   : > { %v598_v27 = vsel %vm592_vm4, %v577_v46, %v556_v26 }
  0xfc   : > { %3288 = vmatmul.msk.bf16.gmra.mxu0 %vm620_vm5, %v598_v27  ;;  %3374 = vmatmul.msk.bf16.gmra.mxu1 %vm620_vm5, %v1050_v43  ;;  %v4420_v43 = vld [vmem:[%s5073_s2] ss:$0 sm:$0xff] }
  0xfd   : > { %3463 = vmatmul.msk.bf16.gmra.mxu2 %vm620_vm5, %v1507_v18  ;;  %v1469_v39 = vpop.permute.xlu1 %1468 }
  0xfe   : > { %v1509_v41 = vsel %vm592_vm4, %v1489_v12, %v1469_v39  ;;  %v509_v48 = vpop.permute.xlu2 %508 }
  0xff   : > { %v581_v50 = vsel %vm571_vm3, %v4158_v62, %v509_v48 }
 0x102   : > { %v1421_v61 = vpop.permute.xlu0 %1420 }
 0x103   : > { %v1491_v60 = vsel %vm571_vm3, %v4075_v54, %v1421_v61 }
 0x107   : > { %v1022_v24 = vpop.permute.xlu2 %1021 }
 0x108   : > { %v968_v52 = vpop.permute.xlu1 %967 }
 0x109   : > { %v1038_v10 = vsel %vm571_vm3, %v4106_v37, %v968_v52 }
 0x10a   : > { %v558_v11 = vpop.permute.xlu0 %557  ;;  %v1058_v13 = vsel %vm592_vm4, %v1038_v10, %v4332_v21 }
 0x10b   : > { %v600_v53 = vsel %vm592_vm4, %v579_v36, %v558_v11 }
 0x10c   : > { %3289 = vmatmul.msk.bf16.gmra.mxu0 %vm620_vm5, %v600_v53  ;;  %3375 = vmatmul.msk.bf16.gmra.mxu1 %vm620_vm5, %v1052_v1 }
 0x10d   : > { %3464 = vmatmul.msk.bf16.gmra.mxu2 %vm620_vm5, %v1509_v41 }
 0x10f   : > { %v511_v5 = vpop.permute.xlu2 %510 }
 0x110   : > { %v1471_v47 = vpop.permute.xlu1 %1470  ;;  %v583_v32 = vsel %vm571_vm3, %v4216_v49, %v511_v5 }
 0x111   : > { %v1511_v63 = vsel %vm592_vm4, %v1491_v60, %v1471_v47 }
 0x112   : > { %v1423_v44 = vpop.permute.xlu0 %1422 }
 0x113   : > { %v1493_v6 = vsel %vm571_vm3, %v4127_v31, %v1423_v44 }
 0x118   : > { %v970_v54 = vpop.permute.xlu1 %969 }
 0x119   : > { %v4366_v2 = vpop.f32.mrf.mxu1  ;;  %v1040_v37 = vsel %vm571_vm3, %v4151_v45, %v970_v54 }
 0x11a   : > { %v560_v28 = vpop.permute.xlu0 %559  ;;  %v1060_v16 = vsel %vm592_vm4, %v1040_v37, %v1020_v56 }
 0x11b   : > { %v602_v23 = vsel %vm592_vm4, %v581_v50, %v560_v28 }
 0x11c   : > { %3290 = vmatmul.msk.bf16.gmra.mxu0 %vm620_vm5, %v602_v23  ;;  %3376 = vmatmul.msk.bf16.gmra.mxu1 %vm620_vm5, %v1054_v14 }
 0x11d   : > { %3465 = vmatmul.msk.bf16.gmra.mxu2 %vm620_vm5, %v1511_v63 }
 0x120   : > { %v1473_v35 = vpop.permute.xlu1 %1472 }
 0x121   : > { %v4375_v30 = vpop.f32.mrf.mxu1  ;;  %v1513_v7 = vsel %vm592_vm4, %v1493_v6, %v1473_v35 }
 0x122   : > { %v1425_v62 = vpop.permute.xlu0 %1424 }
 0x123   : > { %v1495_v17 = vsel %vm571_vm3, %v4171_v8, %v1425_v62 }
 0x128   : > { %v972_v31 = vpop.permute.xlu1 %971 }
 0x129   : > { %v4383_v51 = vpop.f32.mrf.mxu1  ;;  %v1042_v46 = vsel %vm571_vm3, %v4210_v0, %v972_v31 }
 0x12a   : > { %v562_v4 = vpop.permute.xlu0 %561  ;;  %v1062_v26 = vsel %vm592_vm4, %v1042_v46, %v1022_v24 }
 0x12b   : > { %v604_v57 = vsel %vm592_vm4, %v583_v32, %v562_v4 }
 0x12c   : > { %3291 = vmatmul.msk.bf16.gmra.mxu0 %vm620_vm5, %v604_v57  ;;  %3377 = vmatmul.msk.bf16.gmra.mxu1 %vm620_vm5, %v1056_v9 }
 0x12d   : > { %3466 = vmatmul.msk.bf16.gmra.mxu2 %vm620_vm5, %v1513_v7 }
 0x12e   : > { %v1024_v11 = vpop.permute.xlu2 %1023 }
 0x12f   : > { %v1556_v49 = vpop.f32.mrf.mxu2 }
 0x130   : > { %v1475_v22 = vpop.permute.xlu1 %1474 }
 0x131   : > { %v4392_v20 = vpop.f32.mrf.mxu1  ;;  %v1515_v3 = vsel %vm592_vm4, %v1495_v17, %v1475_v22 }
 0x137   : > { %v1558_v15 = vpop.f32.mrf.mxu2 }
 0x138   : > { %v974_v12 = vpop.permute.xlu1 %973 }
 0x139   : > { %v4398_v55 = vpop.f32.mrf.mxu1  ;;  %v1044_v39 = vsel %vm571_vm3, %v4295_v59, %v974_v12 }
 0x13a   : > { %v1064_v40 = vsel %vm592_vm4, %v1044_v39, %v1024_v11 }
 0x13c   : > { %3378 = vmatmul.msk.bf16.gmra.mxu1 %vm620_vm5, %v1058_v13 }
 0x13d   : > { %3467 = vmatmul.msk.bf16.gmra.mxu2 %vm620_vm5, %v1515_v3 }
 0x13f   : > { %v1561_v58 = vpop.f32.mrf.mxu2 }
 0x141   : > { %v4405_v33 = vpop.f32.mrf.mxu1 }
 0x147   : > { %v1563_v19 = vpop.f32.mrf.mxu2 }
 0x149   : > { %v4409_v8 = vpop.f32.mrf.mxu1 }
 0x14c   : > { %3379 = vmatmul.msk.bf16.gmra.mxu1 %vm620_vm5, %v1060_v16 }
 0x14f   : > { %v4425_v29 = vpop.f32.mrf.mxu2 }
 0x151   : > { %v4413_v21 = vpop.f32.mrf.mxu1 }
 0x157   : > { %v4430_v41 = vpop.f32.mrf.mxu2 }
 0x159   : > { %v654_v25 = vpop.f32.mrf.mxu0  ;;  %v1105_v45 = vpop.f32.mrf.mxu1 }
 0x15a   : > { %v704_v18 = vadd.f32 %v4420_v43, %v654_v25 }
 0x15c   : > { %v1155_v27 = vadd.f32 %v1105_v45, %v704_v18  ;;  %3380 = vmatmul.msk.bf16.gmra.mxu1 %vm620_vm5, %v1062_v26 }
 0x15e   : > { %v1606_v38 = vadd.f32 %v1556_v49, %v1155_v27 }
 0x160   : > { %v1626_v56 = vmax.f32 %v1606_v38, 0.0  ;;  %v4435_v24 = vpop.f32.mrf.mxu2 }
 0x161   : > { %v656_v61 = vpop.f32.mrf.mxu0  ;;  %v1107_v34 = vpop.f32.mrf.mxu1 }
 0x162   : > { %v705_v0 = vadd.f32 %v4420_v43, %v656_v61  ;;  %v1646_v53 = vpack.c.bf16 %v1626_v56, %v1626_v56 }
 0x164   : > { %v1156_v36 = vadd.f32 %v1107_v34, %v705_v0  ;;  %v1686_v14 = vunpack.c.l.b16 %v1646_v53 }
 0x166   : > { %v1607_v1 = vadd.f32 %v1558_v15, %v1156_v36 }
 0x168   : > { %v1627_v48 = vmax.f32 %v1607_v1, 0.0  ;;  %v1573_v45 = vpop.f32.mrf.mxu2 }
 0x169   : > { %v659_v52 = vpop.f32.mrf.mxu0  ;;  %v1110_v44 = vpop.f32.mrf.mxu1 }
 0x16a   : > { %v1647_v60 = vpack.c.bf16 %v1627_v48, %v1627_v48  ;;  %v706_v50 = vadd.f32 %v4420_v43, %v659_v52 }
 0x16c   : > { %v1687_v47 = vunpack.c.l.b16 %v1647_v60  ;;  %v1157_v28 = vadd.f32 %v1110_v44, %v706_v50  ;;  %3381 = vmatmul.msk.bf16.gmra.mxu1 %vm620_vm5, %v1064_v40 }
 0x16e   : > { %v1706_v63 = vpack.c.b16 %v1687_v47, %v1686_v14  ;;  %v1608_v23 = vadd.f32 %v1561_v58, %v1157_v28 }
 0x170   : > { %v1717_v59 = vshrl.u32 %v1706_v63, 16  ;;  %v1720_v6 = vshll.u32 %v1706_v63, 16  ;;  %v1628_v4 = vmax.f32 %v1608_v23, 0.0  ;;  %v1576_v48 = vpop.f32.mrf.mxu2 }
 0x171   : > { %v661_v62 = vpop.f32.mrf.mxu0  ;;  %v1112_v5 = vpop.f32.mrf.mxu1 }
 0x172   : > { %v1719_v42 = vrot.slane %v1717_v59, 7  ;;  %v707_v32 = vadd.f32 %v4420_v43, %v661_v62  ;;  %v1648_v22 = vpack.c.bf16 %v1628_v4, %v1628_v4 }
 0x174   : > { %v1722_v9 = vor.u32 %v1720_v6, %v1719_v42  ;;  %v1819_v35 = vsel %vm4437_vm8, %v1719_v42, 0  ;;  %v1158_v7 = vadd.f32 %v1112_v5, %v707_v32 }
 0x175   : > { %v1851_v57 = vunpack.c.l.b16 %v1819_v35 }
 0x176   : > { %v1809_v31 = vsel %vm4437_vm8, 0, %v1722_v9  ;;  %v1609_v49 = vadd.f32 %v1563_v19, %v1158_v7  ;;  %v1688_v19 = vunpack.c.l.b16 %v1648_v22 }
 0x177   : > { %v1849_v10 = vunpack.c.l.b16 %v1809_v31  ;;  %v1850_v17 = vunpack.c.h.b16 %v1809_v31  ;;  %v1881_v13 = vpack.c.b16 %v1851_v57, %v1851_v57 }
 0x178   : > { %v1629_v3 = vmax.f32 %v1609_v49, 0.0  ;;  %v1578_v9 = vpop.f32.mrf.mxu2 }
 0x179   : > { %v1879_v15 = vpack.c.b16 %v1849_v10, %v1849_v10  ;;  %v1880_v37 = vpack.c.b16 %v1850_v17, %v1850_v17  ;;  %1943 = vst.msk [vmem:[#allocation2 + $0x8] sm:$0x1] %vm1942_vm9, %v1881_v13  ;;  %v664_v58 = vpop.f32.mrf.mxu0  ;;  %v1115_v16 = vpop.f32.mrf.mxu1 }
 0x17a   : > { %v1649_v46 = vpack.c.bf16 %v1629_v3, %v1629_v3  ;;  %v708_v25 = vadd.f32 %v4420_v43, %v664_v58 }
 0x17b   : > { %1940 = vst.msk [vmem:[#allocation2] sm:$0xf] %vm1939_vm10, %v1879_v15 }
 0x17c   : > { %1941 = vst.msk [vmem:[#allocation2 + $0x4] sm:$0xf] %vm1939_vm10, %v1880_v37  ;;  %v1689_v26 = vunpack.c.l.b16 %v1649_v46  ;;  %v1159_v18 = vadd.f32 %v1115_v16, %v708_v25 }
 0x17e   : > { %v1707_v27 = vpack.c.b16 %v1689_v26, %v1688_v19  ;;  %v1610_v61 = vadd.f32 %v4425_v29, %v1159_v18 }
 0x180   : > { %v1724_v38 = vshrl.u32 %v1707_v27, 16  ;;  %v1727_v56 = vshll.u32 %v1707_v27, 16  ;;  %v1630_v11 = vmax.f32 %v1610_v61, 0.0  ;;  %v1581_v26 = vpop.f32.mrf.mxu2 }
 0x181   : > { %v666_v34 = vpop.f32.mrf.mxu0  ;;  %v1117_v0 = vpop.f32.mrf.mxu1 }
 0x182   : > { %v1726_v12 = vrot.slane %v1724_v38, 7  ;;  %v709_v36 = vadd.f32 %v4420_v43, %v666_v34  ;;  %v1650_v14 = vpack.c.bf16 %v1630_v11, %v1630_v11 }
 0x184   : > { %v1729_v1 = vor.u32 %v1727_v56, %v1726_v12  ;;  %v1820_v39 = vsel %vm4437_vm8, %v1726_v12, 0  ;;  %v1160_v53 = vadd.f32 %v1117_v0, %v709_v36  ;;  %v1690_v42 = vunpack.c.l.b16 %v1650_v14 }
 0x185   : > { %v1854_v52 = vunpack.c.l.b16 %v1820_v39 }
 0x186   : > { %v1810_v44 = vsel %vm4437_vm8, 0, %v1729_v1  ;;  %v1611_v40 = vadd.f32 %v4430_v41, %v1160_v53 }
 0x187   : > { %v1852_v29 = vunpack.c.l.b16 %v1810_v44  ;;  %v1853_v60 = vunpack.c.h.b16 %v1810_v44  ;;  %v1884_v50 = vpack.c.b16 %v1854_v52, %v1854_v52 }
 0x188   : > { %v1631_v47 = vmax.f32 %v1611_v40, 0.0 }
 0x189   : > { %v1882_v28 = vpack.c.b16 %v1852_v29, %v1852_v29  ;;  %v1883_v63 = vpack.c.b16 %v1853_v60, %v1853_v60  ;;  %1946 = vst.msk [vmem:[#allocation2 + $0x14] sm:$0x1] %vm1942_vm9, %v1884_v50  ;;  %v669_v59 = vpop.f32.mrf.mxu0  ;;  %v1120_v23 = vpop.f32.mrf.mxu1 }
 0x18a   : > { %v1651_v62 = vpack.c.bf16 %v1631_v47, %v1631_v47  ;;  %v710_v5 = vadd.f32 %v4420_v43, %v669_v59  ;;  %v1583_v29 = vpop.f32.mrf.mxu2 }
 0x18b   : > { %1944 = vst.msk [vmem:[#allocation2 + $0xc] sm:$0xf] %vm1939_vm10, %v1882_v28 }
 0x18c   : > { %1945 = vst.msk [vmem:[#allocation2 + $0x10] sm:$0xf] %vm1939_vm10, %v1883_v63  ;;  %v1691_v41 = vunpack.c.l.b16 %v1651_v62  ;;  %v1161_v6 = vadd.f32 %v1120_v23, %v710_v5 }
 0x18e   : > { %v1708_v32 = vpack.c.b16 %v1691_v41, %v1690_v42  ;;  %v1612_v4 = vadd.f32 %v4435_v24, %v1161_v6 }
 0x190   : > { %v1731_v35 = vshrl.u32 %v1708_v32, 16  ;;  %v1734_v49 = vshll.u32 %v1708_v32, 16  ;;  %v1632_v22 = vmax.f32 %v1612_v4, 0.0 }
 0x191   : > { %v671_v7 = vpop.f32.mrf.mxu0  ;;  %v1122_v57 = vpop.f32.mrf.mxu1 }
 0x192   : > { %v1733_v31 = vrot.slane %v1731_v35, 7  ;;  %v711_v10 = vadd.f32 %v4420_v43, %v671_v7  ;;  %v1652_v25 = vpack.c.bf16 %v1632_v22, %v1632_v22 }
 0x194   : > { %v1736_v17 = vor.u32 %v1734_v49, %v1733_v31  ;;  %v1821_v13 = vsel %vm4437_vm8, %v1733_v31, 0  ;;  %v1162_v3 = vadd.f32 %v1122_v57, %v711_v10  ;;  %v1586_v49 = vpop.f32.mrf.mxu2 }
 0x195   : > { %v1857_v15 = vunpack.c.l.b16 %v1821_v13 }
 0x196   : > { %v1811_v37 = vsel %vm4437_vm8, 0, %v1736_v17  ;;  %v1613_v58 = vadd.f32 %v1573_v45, %v1162_v3  ;;  %v1692_v45 = vunpack.c.l.b16 %v1652_v25 }
 0x197   : > { %v1855_v16 = vunpack.c.l.b16 %v1811_v37  ;;  %v1856_v46 = vunpack.c.h.b16 %v1811_v37  ;;  %v1887_v24 = vpack.c.b16 %v1857_v15, %v1857_v15 }
 0x198   : > { %v1633_v19 = vmax.f32 %v1613_v58, 0.0 }
 0x199   : > { %v1885_v18 = vpack.c.b16 %v1855_v16, %v1855_v16  ;;  %v1886_v27 = vpack.c.b16 %v1856_v46, %v1856_v46  ;;  %1949 = vst.msk [vmem:[#allocation2 + $0x20] sm:$0x1] %vm1942_vm9, %v1887_v24  ;;  %v674_v38 = vpop.f32.mrf.mxu0  ;;  %v1125_v61 = vpop.f32.mrf.mxu1 }
 0x19a   : > { %v1653_v34 = vpack.c.bf16 %v1633_v19, %v1633_v19  ;;  %v712_v0 = vadd.f32 %v4420_v43, %v674_v38 }
 0x19b   : > { %1947 = vst.msk [vmem:[#allocation2 + $0x18] sm:$0xf] %vm1939_vm10, %v1885_v18 }
 0x19c   : > { %1948 = vst.msk [vmem:[#allocation2 + $0x1c] sm:$0xf] %vm1939_vm10, %v1886_v27  ;;  %v1693_v12 = vunpack.c.l.b16 %v1653_v34  ;;  %v1163_v56 = vadd.f32 %v1125_v61, %v712_v0  ;;  %v1588_v34 = vpop.f32.mrf.mxu2  ;;  %v716_v0 = vadd.f32 %v4420_v43, %v4366_v2  ;;  %v717_v2 = vadd.f32 %v4420_v43, %v4375_v30 }
 0x19e   : > { %v1709_v36 = vpack.c.b16 %v1693_v12, %v1692_v45  ;;  %v1614_v39 = vadd.f32 %v1576_v48, %v1163_v56 }
 0x1a0   : > { %v1738_v1 = vshrl.u32 %v1709_v36, 16  ;;  %v1741_v44 = vshll.u32 %v1709_v36, 16  ;;  %v1634_v14 = vmax.f32 %v1614_v39, 0.0 }
 0x1a1   : > { %v676_v11 = vpop.f32.mrf.mxu0  ;;  %v1127_v53 = vpop.f32.mrf.mxu1 }
 0x1a2   : > { %v1740_v52 = vrot.slane %v1738_v1, 7  ;;  %v713_v40 = vadd.f32 %v4420_v43, %v676_v11  ;;  %v1654_v5 = vpack.c.bf16 %v1634_v14, %v1634_v14 }
 0x1a4   : > { %v1743_v60 = vor.u32 %v1741_v44, %v1740_v52  ;;  %v1822_v50 = vsel %vm4437_vm8, %v1740_v52, 0  ;;  %v1164_v47 = vadd.f32 %v1127_v53, %v713_v40  ;;  %v1694_v57 = vunpack.c.l.b16 %v1654_v5 }
 0x1a5   : > { %v1860_v28 = vunpack.c.l.b16 %v1822_v50 }
 0x1a6   : > { %v1812_v63 = vsel %vm4437_vm8, 0, %v1743_v60  ;;  %v1615_v59 = vadd.f32 %v1578_v9, %v1164_v47  ;;  %v1591_v60 = vpop.f32.mrf.mxu2 }
 0x1a7   : > { %v1858_v23 = vunpack.c.l.b16 %v1812_v63  ;;  %v1859_v48 = vunpack.c.h.b16 %v1812_v63  ;;  %v1890_v62 = vpack.c.b16 %v1860_v28, %v1860_v28 }
 0x1a8   : > { %v1635_v42 = vmax.f32 %v1615_v59, 0.0 }
 0x1a9   : > { %v1888_v41 = vpack.c.b16 %v1858_v23, %v1858_v23  ;;  %v1889_v6 = vpack.c.b16 %v1859_v48, %v1859_v48  ;;  %1952 = vst.msk [vmem:[#allocation2 + $0x2c] sm:$0x1] %vm1942_vm9, %v1890_v62  ;;  %v679_v32 = vpop.f32.mrf.mxu0  ;;  %v1130_v35 = vpop.f32.mrf.mxu1 }
 0x1aa   : > { %v1655_v4 = vpack.c.bf16 %v1635_v42, %v1635_v42  ;;  %v714_v7 = vadd.f32 %v4420_v43, %v679_v32 }
 0x1ab   : > { %1950 = vst.msk [vmem:[#allocation2 + $0x24] sm:$0xf] %vm1939_vm10, %v1888_v41 }
 0x1ac   : > { %1951 = vst.msk [vmem:[#allocation2 + $0x28] sm:$0xf] %vm1939_vm10, %v1889_v6  ;;  %v1695_v9 = vunpack.c.l.b16 %v1655_v4  ;;  %v1165_v31 = vadd.f32 %v1130_v35, %v714_v7  ;;  %v718_v35 = vadd.f32 %v4420_v43, %v4383_v51  ;;  %v719_v51 = vadd.f32 %v4420_v43, %v4392_v20 }
 0x1ae   : > { %v1710_v10 = vpack.c.b16 %v1695_v9, %v1694_v57  ;;  %v1616_v13 = vadd.f32 %v1581_v26, %v1165_v31 }
 0x1b0   : > { %v1745_v17 = vshrl.u32 %v1710_v10, 16  ;;  %v1748_v37 = vshll.u32 %v1710_v10, 16  ;;  %v1636_v24 = vmax.f32 %v1616_v13, 0.0 }
 0x1b1   : > { %v681_v22 = vpop.f32.mrf.mxu0  ;;  %v1132_v3 = vpop.f32.mrf.mxu1 }
 0x1b2   : > { %v1747_v15 = vrot.slane %v1745_v17, 7  ;;  %v715_v58 = vadd.f32 %v4420_v43, %v681_v22  ;;  %v1656_v45 = vpack.c.bf16 %v1636_v24, %v1636_v24  ;;  %v1593_v17 = vpop.f32.mrf.mxu2 }
 0x1b4   : > { %v1750_v16 = vor.u32 %v1748_v37, %v1747_v15  ;;  %v1823_v46 = vsel %vm4437_vm8, %v1747_v15, 0  ;;  %v1166_v25 = vadd.f32 %v1132_v3, %v715_v58  ;;  %v1696_v53 = vunpack.c.l.b16 %v1656_v45 }
 0x1b5   : > { %v1863_v19 = vunpack.c.l.b16 %v1823_v46 }
 0x1b6   : > { %v1813_v18 = vsel %vm4437_vm8, 0, %v1750_v16  ;;  %v1617_v27 = vadd.f32 %v1583_v29, %v1166_v25 }
 0x1b7   : > { %v1861_v38 = vunpack.c.l.b16 %v1813_v18  ;;  %v1862_v61 = vunpack.c.h.b16 %v1813_v18  ;;  %v1893_v26 = vpack.c.b16 %v1863_v19, %v1863_v19 }
 0x1b8   : > { %v1637_v12 = vmax.f32 %v1617_v27, 0.0 }
 0x1b9   : > { %v1891_v56 = vpack.c.b16 %v1861_v38, %v1861_v38  ;;  %v1892_v36 = vpack.c.b16 %v1862_v61, %v1862_v61  ;;  %1955 = vst.msk [vmem:[#allocation2 + $0x38] sm:$0x1] %vm1942_vm9, %v1893_v26  ;;  %v1135_v1 = vpop.f32.mrf.mxu1 }
 0x1ba   : > { %v1657_v39 = vpack.c.bf16 %v1637_v12, %v1637_v12  ;;  %v1167_v11 = vadd.f32 %v1135_v1, %v716_v0 }
 0x1bb   : > { %1953 = vst.msk [vmem:[#allocation2 + $0x30] sm:$0xf] %vm1939_vm10, %v1891_v56  ;;  %v720_v56 = vadd.f32 %v4420_v43, %v4398_v55 }
 0x1bc   : > { %1954 = vst.msk [vmem:[#allocation2 + $0x34] sm:$0xf] %vm1939_vm10, %v1892_v36  ;;  %v1697_v52 = vunpack.c.l.b16 %v1657_v39  ;;  %v1618_v40 = vadd.f32 %v1586_v49, %v1167_v11 }
 0x1be   : > { %v1711_v44 = vpack.c.b16 %v1697_v52, %v1696_v53  ;;  %v1638_v28 = vmax.f32 %v1618_v40, 0.0 }
 0x1c0   : > { %v1752_v29 = vshrl.u32 %v1711_v44, 16  ;;  %v1755_v47 = vshll.u32 %v1711_v44, 16  ;;  %v1658_v42 = vpack.c.bf16 %v1638_v28, %v1638_v28 }
 0x1c1   : > { %v1137_v50 = vpop.f32.mrf.mxu1 }
 0x1c2   : > { %v1754_v14 = vrot.slane %v1752_v29, 7  ;;  %v1168_v63 = vadd.f32 %v1137_v50, %v717_v2  ;;  %v1698_v31 = vunpack.c.l.b16 %v1658_v42  ;;  %v721_v29 = vadd.f32 %v4420_v43, %v4405_v33 }
 0x1c4   : > { %v1757_v59 = vor.u32 %v1755_v47, %v1754_v14  ;;  %v1824_v23 = vsel %vm4437_vm8, %v1754_v14, 0  ;;  %v1619_v48 = vadd.f32 %v1588_v34, %v1168_v63  ;;  %v1596_v34 = vpop.f32.mrf.mxu2 }
 0x1c5   : > { %v1866_v62 = vunpack.c.l.b16 %v1824_v23 }
 0x1c6   : > { %v1814_v5 = vsel %vm4437_vm8, 0, %v1757_v59  ;;  %v1639_v41 = vmax.f32 %v1619_v48, 0.0 }
 0x1c7   : > { %v1864_v6 = vunpack.c.l.b16 %v1814_v5  ;;  %v1865_v30 = vunpack.c.h.b16 %v1814_v5  ;;  %v1896_v32 = vpack.c.b16 %v1866_v62, %v1866_v62 }
 0x1c8   : > { %v1659_v4 = vpack.c.bf16 %v1639_v41, %v1639_v41 }
 0x1c9   : > { %v1894_v7 = vpack.c.b16 %v1864_v6, %v1864_v6  ;;  %v1895_v57 = vpack.c.b16 %v1865_v30, %v1865_v30  ;;  %1958 = vst.msk [vmem:[#allocation2 + $0x44] sm:$0x1] %vm1942_vm9, %v1896_v32  ;;  %v1140_v9 = vpop.f32.mrf.mxu1  ;;  %v722_v32 = vadd.f32 %v4420_v43, %v4409_v8 }
 0x1ca   : > { %v1699_v49 = vunpack.c.l.b16 %v1659_v4  ;;  %v1169_v10 = vadd.f32 %v1140_v9, %v718_v35 }
 0x1cb   : > { %1956 = vst.msk [vmem:[#allocation2 + $0x3c] sm:$0xf] %vm1939_vm10, %v1894_v7 }
 0x1cc   : > { %1957 = vst.msk [vmem:[#allocation2 + $0x40] sm:$0xf] %vm1939_vm10, %v1895_v57  ;;  %v1712_v13 = vpack.c.b16 %v1699_v49, %v1698_v31  ;;  %v1620_v3 = vadd.f32 %v1591_v60, %v1169_v10  ;;  %v1598_v2 = vpop.f32.mrf.mxu2 }
 0x1ce   : > { %v1759_v22 = vshrl.u32 %v1712_v13, 16  ;;  %v1762_v37 = vshll.u32 %v1712_v13, 16  ;;  %v1640_v24 = vmax.f32 %v1620_v3, 0.0  ;;  %v723_v13 = vadd.f32 %v4420_v43, %v4413_v21 }
 0x1d0   : > { %v1761_v15 = vrot.slane %v1759_v22, 7  ;;  %v1660_v0 = vpack.c.bf16 %v1640_v24, %v1640_v24 }
 0x1d1   : > { %v1142_v58 = vpop.f32.mrf.mxu1 }
 0x1d2   : > { %v1764_v16 = vor.u32 %v1762_v37, %v1761_v15  ;;  %v1825_v46 = vsel %vm4437_vm8, %v1761_v15, 0  ;;  %v1170_v25 = vadd.f32 %v1142_v58, %v719_v51  ;;  %v1700_v39 = vunpack.c.l.b16 %v1660_v0 }
 0x1d3   : > { %v1869_v19 = vunpack.c.l.b16 %v1825_v46 }
 0x1d4   : > { %v1815_v18 = vsel %vm4437_vm8, 0, %v1764_v16  ;;  %v1621_v27 = vadd.f32 %v1593_v17, %v1170_v25  ;;  %v1601_v4 = vpop.f32.mrf.mxu2 }
 0x1d5   : > { %v1867_v38 = vunpack.c.l.b16 %v1815_v18  ;;  %v1868_v61 = vunpack.c.h.b16 %v1815_v18  ;;  %v1899_v26 = vpack.c.b16 %v1869_v19, %v1869_v19 }
 0x1d6   : > { %v1641_v20 = vmax.f32 %v1621_v27, 0.0 }
 0x1d7   : > { %v1897_v45 = vpack.c.b16 %v1867_v38, %v1867_v38  ;;  %v1898_v12 = vpack.c.b16 %v1868_v61, %v1868_v61  ;;  %1961 = vst.msk [vmem:[#allocation2 + $0x50] sm:$0x1] %vm1942_vm9, %v1899_v26 }
 0x1d8   : > { %v1661_v36 = vpack.c.bf16 %v1641_v20, %v1641_v20 }
 0x1d9   : > { %1959 = vst.msk [vmem:[#allocation2 + $0x48] sm:$0xf] %vm1939_vm10, %v1897_v45  ;;  %v1145_v1 = vpop.f32.mrf.mxu1 }
 0x1da   : > { %1960 = vst.msk [vmem:[#allocation2 + $0x4c] sm:$0xf] %vm1939_vm10, %v1898_v12  ;;  %v1701_v11 = vunpack.c.l.b16 %v1661_v36  ;;  %v1171_v53 = vadd.f32 %v1145_v1, %v720_v56 }
 0x1dc   : > { %v1713_v52 = vpack.c.b16 %v1701_v11, %v1700_v39  ;;  %v1622_v40 = vadd.f32 %v1596_v34, %v1171_v53  ;;  %v1603_v46 = vpop.f32.mrf.mxu2 }
 0x1de   : > { %v1766_v44 = vshrl.u32 %v1713_v52, 16  ;;  %v1769_v50 = vshll.u32 %v1713_v52, 16  ;;  %v1642_v28 = vmax.f32 %v1622_v40, 0.0 }
 0x1e0   : > { %v1768_v60 = vrot.slane %v1766_v44, 7  ;;  %v1662_v41 = vpack.c.bf16 %v1642_v28, %v1642_v28 }
 0x1e1   : > { %v1147_v14 = vpop.f32.mrf.mxu1 }
 0x1e2   : > { %v1771_v55 = vor.u32 %v1769_v50, %v1768_v60  ;;  %v1826_v47 = vsel %vm4437_vm8, %v1768_v60, 0  ;;  %v1172_v63 = vadd.f32 %v1147_v14, %v721_v29  ;;  %v1702_v57 = vunpack.c.l.b16 %v1662_v41 }
 0x1e3   : > { %v1872_v59 = vunpack.c.l.b16 %v1826_v47 }
 0x1e4   : > { %v1816_v23 = vsel %vm4437_vm8, 0, %v1771_v55  ;;  %v1623_v48 = vadd.f32 %v1598_v2, %v1172_v63 }
 0x1e5   : > { %v1870_v62 = vunpack.c.l.b16 %v1816_v23  ;;  %v1871_v5 = vunpack.c.h.b16 %v1816_v23  ;;  %v1902_v42 = vpack.c.b16 %v1872_v59, %v1872_v59 }
 0x1e6   : > { %v1643_v6 = vmax.f32 %v1623_v48, 0.0 }
 0x1e7   : > { %v1900_v33 = vpack.c.b16 %v1870_v62, %v1870_v62  ;;  %v1901_v30 = vpack.c.b16 %v1871_v5, %v1871_v5  ;;  %1964 = vst.msk [vmem:[#allocation2 + $0x5c] sm:$0x1] %vm1942_vm9, %v1902_v42 }
 0x1e8   : > { %v1663_v35 = vpack.c.bf16 %v1643_v6, %v1643_v6 }
 0x1e9   : > { %1962 = vst.msk [vmem:[#allocation2 + $0x54] sm:$0xf] %vm1939_vm10, %v1900_v33  ;;  %v1150_v7 = vpop.f32.mrf.mxu1 }
 0x1ea   : > { %1963 = vst.msk [vmem:[#allocation2 + $0x58] sm:$0xf] %vm1939_vm10, %v1901_v30  ;;  %v1703_v9 = vunpack.c.l.b16 %v1663_v35  ;;  %v1173_v31 = vadd.f32 %v1150_v7, %v722_v32 }
 0x1ec   : > { %v1714_v49 = vpack.c.b16 %v1703_v9, %v1702_v57  ;;  %v1624_v17 = vadd.f32 %v1601_v4, %v1173_v31 }
 0x1ee   : > { %v1773_v10 = vshrl.u32 %v1714_v49, 16  ;;  %v1776_v3 = vshll.u32 %v1714_v49, 16  ;;  %v1644_v37 = vmax.f32 %v1624_v17, 0.0 }
 0x1f0   : > { %v1775_v22 = vrot.slane %v1773_v10, 7  ;;  %v1664_v38 = vpack.c.bf16 %v1644_v37, %v1644_v37 }
 0x1f1   : > { %v1152_v51 = vpop.f32.mrf.mxu1 }
 0x1f2   : > { %v1778_v8 = vor.u32 %v1776_v3, %v1775_v22  ;;  %v1827_v15 = vsel %vm4437_vm8, %v1775_v22, 0  ;;  %v1174_v58 = vadd.f32 %v1152_v51, %v723_v13  ;;  %v1704_v34 = vunpack.c.l.b16 %v1664_v38 }
 0x1f3   : > { %v1875_v16 = vunpack.c.l.b16 %v1827_v15 }
 0x1f4   : > { %v1817_v24 = vsel %vm4437_vm8, 0, %v1778_v8  ;;  %v1625_v25 = vadd.f32 %v1603_v46, %v1174_v58 }
 0x1f5   : > { %v1873_v19 = vunpack.c.l.b16 %v1817_v24  ;;  %v1874_v18 = vunpack.c.h.b16 %v1817_v24  ;;  %v1905_v27 = vpack.c.b16 %v1875_v16, %v1875_v16 }
 0x1f6   : > { %v1645_v21 = vmax.f32 %v1625_v25, 0.0 }
 0x1f7   : > { %v1903_v43 = vpack.c.b16 %v1873_v19, %v1873_v19  ;;  %v1904_v61 = vpack.c.b16 %v1874_v18, %v1874_v18  ;;  %1967 = vst.msk [vmem:[#allocation2 + $0x68] sm:$0x1] %vm1942_vm9, %v1905_v27 }
 0x1f8   : > { %v1665_v26 = vpack.c.bf16 %v1645_v21, %v1645_v21 }
 0x1f9   : > { %1965 = vst.msk [vmem:[#allocation2 + $0x60] sm:$0xf] %vm1939_vm10, %v1903_v43 }
 0x1fa   : > { %1966 = vst.msk [vmem:[#allocation2 + $0x64] sm:$0xf] %vm1939_vm10, %v1904_v61  ;;  %v1705_v0 = vunpack.c.l.b16 %v1665_v26 }
 0x1fc   : > { %v1715_v20 = vpack.c.b16 %v1705_v0, %v1704_v34 }
 0x1fe   : > { %v1780_v45 = vshrl.u32 %v1715_v20, 16  ;;  %v1783_v56 = vshll.u32 %v1715_v20, 16 }
 0x200   : > { %v1782_v12 = vrot.slane %v1780_v45, 7 }
 0x202   : > { %v1785_v36 = vor.u32 %v1783_v56, %v1782_v12  ;;  %v1828_v1 = vsel %vm4437_vm8, %v1782_v12, 0 }
 0x203   : > { %v1878_v39 = vunpack.c.l.b16 %v1828_v1 }
 0x204   : > { %v1818_v11 = vsel %vm4437_vm8, 0, %v1785_v36 }
 0x205   : > { %v1876_v53 = vunpack.c.l.b16 %v1818_v11  ;;  %v1877_v52 = vunpack.c.h.b16 %v1818_v11  ;;  %v1908_v44 = vpack.c.b16 %v1878_v39, %v1878_v39 }
 0x206   : > { %1974 = sbr.rel (%p3468_p8) target bundleno = 527 (0x20f), region = 44 }
 0x207   : > { %v1906_v40 = vpack.c.b16 %v1876_v53, %v1876_v53  ;;  %v1907_v2 = vpack.c.b16 %v1877_v52, %v1877_v52  ;;  %1970 = vst.msk [vmem:[#allocation2 + $0x74] sm:$0x1] %vm1942_vm9, %v1908_v44 }
 0x209   : > { %1968 = vst.msk [vmem:[#allocation2 + $0x6c] sm:$0xf] %vm1939_vm10, %v1906_v40 }
 0x20a   : > { %1969 = vst.msk [vmem:[#allocation2 + $0x70] sm:$0xf] %vm1939_vm10, %v1907_v2 }
 0x20b   : > { %v3764_v29 = vmov 0  }
 0x20c   : > { %1975 = vst.msk [vmem:[#allocation2] sm:$0xf] %vm1939_vm10, %v3764_v29 }
 0x20d   : > { %1976 = vst.msk [vmem:[#allocation2 + $0x4] sm:$0xf] %vm1939_vm10, %v3764_v29 }
 0x20e   : > { %1977 = vst.msk [vmem:[#allocation2 + $0x8] sm:$0x1] %vm1942_vm9, %v3764_v29 }
 0x20f PF: > { %p3469_p9 = scmp.ne.s32.totalorder %s3744_s18, 1 }
 0x211   : > { %1981 = sbr.rel (%p3469_p9) target bundleno = 538 (0x21a), region = 48 }
 0x216   : > { %v3765_v54 = vmov 0  }
 0x217   : > { %1983 = vst.msk [vmem:[#allocation2 + $0x6c] sm:$0xf] %vm1939_vm10, %v3765_v54 }
 0x218   : > { %1984 = vst.msk [vmem:[#allocation2 + $0x70] sm:$0xf] %vm1939_vm10, %v3765_v54 }
 0x219   : > { %1985 = vst.msk [vmem:[#allocation2 + $0x74] sm:$0x1] %vm1942_vm9, %v3765_v54 }
 0x21a PF: > { %v4547_v60 = vld [vmem:[#allocation2 + $0x18] sm:$0xff]  ;;  %v1998_v50 = vld [vmem:[#allocation2 + $0x20] sm:$0x1]  ;;  %v4549_v14 = vld [vmem:[#allocation2 + $0x24] sm:$0xff]  ;;  %s3766_s18 = smov 16   ;;  %vm2292_vm11 = vcmask 1043456  }
 0x21b   : > { %v2064_v55 = vunpack.c.l.b16 %v1998_v50  ;;  %v2001_v47 = vld [vmem:[#allocation2 + $0x2c] sm:$0x1]  ;;  %v2103_v28 = vshrl.u32 %v4547_v60, 16  ;;  %v2105_v63 = vshll.u32 %v4547_v60, 16  ;;  %v2115_v48 = vshrl.u32 %v4549_v14, 16  ;;  %v4555_v7 = vld [vmem:[#allocation2 + $0x3c] sm:$0xff] }
 0x21c   : > { %v2065_v59 = vunpack.c.l.b16 %v2001_v47  ;;  %v2117_v62 = vshll.u32 %v4549_v14, 16  ;;  %v2007_v41 = vld [vmem:[#allocation2 + $0x44] sm:$0x1]  ;;  %v2196_v10 = vrot.slane %v4547_v60, 1  ;;  %v2141_v22 = vshll.u32 %v4555_v7, 16  ;;  %v4567_v25 = vld [vmem:[#allocation2 + $0x54] sm:$0xff] }
 0x21d   : > { %v2072_v23 = vpack.c.b16 %v2064_v55, %v2064_v55  ;;  %v2107_v5 = vrot.slane %v2105_v63, 1  ;;  %v2067_v57 = vunpack.c.l.b16 %v2007_v41  ;;  %v2199_v3 = vrot.slane %v4549_v14, 1  ;;  %v2013_v8 = vld [vmem:[#allocation2 + $0x5c] sm:$0x1]  ;;  %v2010_v24 = vld [vmem:[#allocation2 + $0x50] sm:$0x1] }
 0x21e   : > { %v2073_v42 = vpack.c.b16 %v2065_v59, %v2065_v59  ;;  %v2119_v33 = vrot.slane %v2117_v62, 1  ;;  %v2139_v37 = vshrl.u32 %v4555_v7, 16  ;;  %v2143_v58 = vrot.slane %v2141_v22, 1  ;;  %v2004_v18 = vld [vmem:[#allocation2 + $0x38] sm:$0x1]  ;;  %v4571_v21 = vld [vmem:[#allocation2 + $0x30] sm:$0xff] }
 0x21f   : > { %v2110_v6 = vshll.u32 %v2072_v23, 16  ;;  %v2108_v30 = vor.u32 %v2107_v5, %v2103_v28  ;;  %v2197_v17 = vrot.slane %v2072_v23, 1  ;;  %v2075_v13 = vpack.c.b16 %v2067_v57, %v2067_v57  ;;  %v2364_v45 = vld [vmem:[#allocation2 + $0x14] sm:$0x1]  ;;  %v4580_v39 = vld [vmem:[#allocation2 + $0x48] sm:$0xff] }
 0x220   : > { %v2122_v32 = vshll.u32 %v2073_v42, 16  ;;  %v2120_v4 = vor.u32 %v2119_v33, %v2115_v48  ;;  %v2200_v51 = vrot.slane %v2073_v42, 1  ;;  %v2069_v19 = vunpack.c.l.b16 %v2013_v8  ;;  %v4585_v44 = vld [vmem:[#allocation2 + $0xc] sm:$0xff]  ;;  %v2367_v42 = vld [vmem:[#allocation2 + $0x20] sm:$0x1] }
 0x221   : > { %v2112_v35 = vrot.slane %v2110_v6, 1  ;;  %v2198_v15 = vsel %vm520_vm1, %v2196_v10, %v2197_v17  ;;  %v2146_v16 = vshll.u32 %v2075_v13, 16  ;;  %v2205_v27 = vrot.slane %v4555_v7, 1  ;;  %v2734_v57 = vld [vmem:[#allocation2 + $0x20] sm:$0x1] }
 0x222   : > { %v2124_v9 = vrot.slane %v2122_v32, 1  ;;  %v2201_v46 = vsel %vm520_vm1, %v2199_v3, %v2200_v51  ;;  %v2206_v38 = vrot.slane %v2075_v13, 1  ;;  %v2144_v43 = vor.u32 %v2143_v58, %v2139_v37  ;;  %v4611_v58 = vld [vmem:[#allocation2 + $0x18] sm:$0xff] }
 0x223   : > { %v2113_v31 = vsel %vm379_vm0, %v2108_v30, %v2112_v35  ;;  %v2148_v61 = vrot.slane %v2146_v16, 1  ;;  %v2068_v26 = vunpack.c.l.b16 %v2010_v24  ;;  %v2066_v34 = vunpack.c.l.b16 %v2004_v18 }
 0x224   : > { %2178 = vrot.lane.b32.xlu0 %v2113_v31, %s3763_s17  ;;  %v2125_v49 = vsel %vm379_vm0, %v2120_v4, %v2124_v9  ;;  %v4574_v0 = vpack.c.b16 %v2069_v19, %v2069_v19  ;;  %v2165_v20 = vshll.u32 %v4567_v25, 16  ;;  %v2127_v12 = vshrl.u32 %v4571_v21, 16  ;;  %v4600_v9 = vld [vmem:[#allocation2 + $0x18] sm:$0xff] }
 0x225   : > { %2180 = vrot.lane.b32.xlu1 %v2125_v49, %s3763_s17  ;;  %v2129_v56 = vshll.u32 %v4571_v21, 16  ;;  %v2074_v36 = vpack.c.b16 %v2066_v34, %v2066_v34  ;;  %v2207_v1 = vsel %vm520_vm1, %v2205_v27, %v2206_v38  ;;  %v2149_v53 = vsel %vm379_vm0, %v2144_v43, %v2148_v61 }
 0x226   : > { %v4583_v52 = vpack.c.b16 %v2068_v26, %v2068_v26  ;;  %v2434_v40 = vunpack.c.l.b16 %v2364_v45  ;;  %v2163_v29 = vshrl.u32 %v4567_v25, 16  ;;  %v2167_v54 = vrot.slane %v2165_v20, 1 }
 0x227   : > { %v2131_v11 = vrot.slane %v2129_v56, 1  ;;  %v2134_v2 = vshll.u32 %v2074_v36, 16  ;;  %v2170_v50 = vshll.u32 %v4574_v0, 16  ;;  %v2208_v28 = vrot.slane %v4580_v39, 1 }
 0x228   : > { %v2209_v63 = vrot.slane %v4583_v52, 1  ;;  %v2442_v59 = vpack.c.b16 %v2434_v40, %v2434_v40  ;;  %v2453_v23 = vshll.u32 %v4585_v44, 16  ;;  %v2168_v62 = vor.u32 %v2167_v54, %v2163_v29  ;;  %v2370_v40 = vld [vmem:[#allocation2 + $0x2c] sm:$0x1] }
 0x229   : > { %v2132_v55 = vor.u32 %v2131_v11, %v2127_v12  ;;  %v2136_v47 = vrot.slane %v2134_v2, 1  ;;  %v2172_v5 = vrot.slane %v2170_v50, 1  ;;  %v2202_v41 = vrot.slane %v4571_v21, 1  ;;  %v2740_v12 = vld [vmem:[#allocation2 + $0x38] sm:$0x1]  ;;  %v4628_v2 = vld [vmem:[#allocation2 + $0x30] sm:$0xff] }
 0x22a   : > { %v2203_v6 = vrot.slane %v2074_v36, 1  ;;  %v2210_v33 = vsel %vm520_vm1, %v2208_v28, %v2209_v63  ;;  %v2451_v30 = vshrl.u32 %v4585_v44, 16  ;;  %v2455_v32 = vrot.slane %v2453_v23, 1 }
 0x22b   : > { %v2137_v48 = vsel %vm379_vm0, %v2132_v55, %v2136_v47  ;;  %v2458_v35 = vshll.u32 %v2442_v59, 16  ;;  %v2173_v4 = vsel %vm379_vm0, %v2168_v62, %v2172_v5  ;;  %v2435_v31 = vunpack.c.l.b16 %v2367_v42  ;;  %v2373_v47 = vld [vmem:[#allocation2 + $0x38] sm:$0x1]  ;;  %v4639_v42 = vld [vmem:[#allocation2 + $0x24] sm:$0xff] }
 0x22c   : > { %2218 = vrot.lane.b32.xlu0 %v2198_v15, %s3766_s18  ;;  %2182 = vrot.lane.b32.xlu2 %v2137_v48, %s3763_s17  ;;  %v2204_v49 = vsel %vm520_vm1, %v2202_v41, %v2203_v6  ;;  %v2456_v10 = vor.u32 %v2455_v32, %v2451_v30  ;;  %v2804_v13 = vunpack.c.l.b16 %v2734_v57  ;;  %v2562_v22 = vrot.slane %v4585_v44, 1  ;;  %v2737_v15 = vld [vmem:[#allocation2 + $0x2c] sm:$0x1]  ;;  %v4636_v48 = vld [vmem:[#allocation2 + $0x30] sm:$0xff] }
 0x22d   : > { %2220 = vrot.lane.b32.xlu1 %v2201_v46, %s3766_s18  ;;  %v2460_v17 = vrot.slane %v2458_v35, 1  ;;  %v2563_v3 = vrot.slane %v2442_v59, 1  ;;  %v4606_v51 = vpack.c.b16 %v2435_v31, %v2435_v31  ;;  %v2465_v8 = vshll.u32 %v4600_v9, 16  ;;  %v4615_v46 = vld [vmem:[#allocation2 + $0x24] sm:$0xff] }
 0x22e   : > { %v4613_v16 = vpack.c.b16 %v2804_v13, %v2804_v13  ;;  %v2805_v24 = vunpack.c.l.b16 %v2737_v15  ;;  %v2463_v18 = vshrl.u32 %v4600_v9, 16  ;;  %v2932_v43 = vrot.slane %v4611_v58, 1 }
 0x22f   : > { %v2461_v37 = vsel %vm379_vm0, %v2456_v10, %v2460_v17  ;;  %v2564_v19 = vsel %vm520_vm1, %v2562_v22, %v2563_v3  ;;  %v2467_v27 = vrot.slane %v2465_v8, 1  ;;  %v2470_v38 = vshll.u32 %v4606_v51, 16  ;;  %v2376_v17 = vld [vmem:[#allocation2 + $0x44] sm:$0x1] }
 0x230   : > { %v2933_v61 = vrot.slane %v4613_v16, 1  ;;  %v2813_v26 = vpack.c.b16 %v2805_v24, %v2805_v24  ;;  %v2835_v34 = vshll.u32 %v4615_v46, 16  ;;  %v2833_v36 = vshrl.u32 %v4615_v46, 16  ;;  %v4654_v24 = vld [vmem:[#allocation2 + $0x3c] sm:$0xff] }
 0x231   : > { %v2468_v20 = vor.u32 %v2467_v27, %v2463_v18  ;;  %v2472_v45 = vrot.slane %v2470_v38, 1  ;;  %v2806_v29 = vunpack.c.l.b16 %v2740_v12  ;;  %v2436_v55 = vunpack.c.l.b16 %v2370_v40 }
 0x232   : > { %v2934_v56 = vsel %vm520_vm1, %v2932_v43, %v2933_v61  ;;  %v2840_v11 = vshll.u32 %v2813_v26, 16  ;;  %v2935_v28 = vrot.slane %v4615_v46, 1  ;;  %v2936_v63 = vrot.slane %v2813_v26, 1 }
 0x233   : > { %v4633_v59 = vpack.c.b16 %v2806_v29, %v2806_v29  ;;  %v2847_v23 = vshll.u32 %v4628_v2, 16  ;;  %v2437_v62 = vunpack.c.l.b16 %v2373_v47  ;;  %v4641_v41 = vpack.c.b16 %v2436_v55, %v2436_v55 }
 0x234   : > { %2184 = vrot.lane.b32.xlu0 %v2149_v53, %s3763_s17  ;;  %2222 = vrot.lane.b32.xlu2 %v2204_v49, %s3766_s18  ;;  %v2473_v53 = vsel %vm379_vm0, %v2468_v20, %v2472_v45  ;;  %v2842_v50 = vrot.slane %v2840_v11, 1  ;;  %v2937_v6 = vsel %vm520_vm1, %v2935_v28, %v2936_v63  ;;  %v2568_v57 = vrot.slane %v4639_v42, 1  ;;  %v4665_v11 = vld [vmem:[#allocation2 + $0x48] sm:$0xff] }
 0x235   : > { %2224 = vrot.lane.b32.xlu1 %v2207_v1, %s3766_s18  ;;  %v2837_v1 = vrot.slane %v2835_v34, 1  ;;  %v2849_v30 = vrot.slane %v2847_v23, 1  ;;  %v2852_v32 = vshll.u32 %v4633_v59, 16  ;;  %v2445_v35 = vpack.c.b16 %v2437_v62, %v2437_v62 }
 0x236   : > { %v2569_v31 = vrot.slane %v4641_v41, 1  ;;  %v2487_v13 = vshrl.u32 %v4636_v48, 16  ;;  %v2571_v38 = vrot.slane %v4636_v48, 1  ;;  %v2153_v43 = vshll.u32 %v4580_v39, 16 }
 0x237   : > { %v2838_v54 = vor.u32 %v2837_v1, %v2833_v36  ;;  %v2854_v10 = vrot.slane %v2852_v32, 1  ;;  %v2494_v3 = vshll.u32 %v2445_v35, 16  ;;  %v2572_v61 = vrot.slane %v2445_v35, 1  ;;  %v2749_v32 = vld [vmem:[#allocation2 + $0x5c] sm:$0x1] }
 0x238   : > { %v2570_v8 = vsel %vm520_vm1, %v2568_v57, %v2569_v31  ;;  %v2151_v34 = vshrl.u32 %v4580_v39, 16  ;;  %v2158_v20 = vshll.u32 %v4583_v52, 16  ;;  %v2501_v12 = vshll.u32 %v4654_v24, 16 }
 0x239   : > { %v2843_v5 = vsel %vm379_vm0, %v2838_v54, %v2842_v50  ;;  %v2496_v27 = vrot.slane %v2494_v3, 1  ;;  %v2155_v36 = vrot.slane %v2153_v43, 1  ;;  %v2573_v29 = vsel %vm520_vm1, %v2571_v38, %v2572_v61  ;;  %v4669_v54 = vld [vmem:[#allocation2 + $0x3c] sm:$0xff] }
 0x23a   : > { %v2160_v1 = vrot.slane %v2158_v20, 1  ;;  %v2499_v52 = vshrl.u32 %v4654_v24, 16  ;;  %v2503_v47 = vrot.slane %v2501_v12, 1  ;;  %v2871_v23 = vshll.u32 %v4665_v11, 16  ;;  %v4700_v12 = vld [vmem:[#allocation2 + $0x48] sm:$0xff] }
 0x23b   : > { %v2941_v62 = vrot.slane %v4669_v54, 1  ;;  %v2869_v35 = vshrl.u32 %v4665_v11, 16  ;;  %vm2246_vm12 = vcmask 130048   ;;  %vm2275_vm13 = vcmask 195584  }
 0x23c   : > { %2226 = vrot.lane.b32.xlu0 %v2210_v33, %s3766_s18  ;;  %v2845_v33 = vshrl.u32 %v4628_v2, 16 }
 0x23d   : > { %2188 = vrot.lane.b32.xlu1 %v2173_v4, %s3763_s17  ;;  %v2489_v4 = vshll.u32 %v4636_v48, 16 }
 0x23e   : > { %v2850_v49 = vor.u32 %v2849_v30, %v2845_v33  ;;  %v2504_v33 = vor.u32 %v2503_v47, %v2499_v52  ;;  %v2577_v47 = vrot.slane %v4700_v12, 1 }
 0x23f   : > { %v2491_v22 = vrot.slane %v2489_v4, 1  ;;  %v2873_v4 = vrot.slane %v2871_v23, 1 }
 0x240   : > { %v2855_v15 = vsel %vm379_vm0, %v2850_v49, %v2854_v10  ;;  %v2379_v10 = vld [vmem:[#allocation2 + $0x50] sm:$0x1] }
 0x241   : > { %v2492_v18 = vor.u32 %v2491_v22, %v2487_v13  ;;  %v2809_v13 = vunpack.c.l.b16 %v2749_v32  ;;  %v2874_v22 = vor.u32 %v2873_v4, %v2869_v35  ;;  %v3651_v4 = vld [vmem:[%s5074_s3] sm:$0xff] }
 0x243   : > { %v2497_v40 = vsel %vm379_vm0, %v2492_v18, %v2496_v27  ;;  %v2944_v18 = vrot.slane %v4665_v11, 1  ;;  %v4692_v38 = vpack.c.b16 %v2809_v13, %v2809_v13  ;;  %v2823_v13 = vshll.u32 %v4611_v58, 16 }
 0x244   : > { %2546 = vrot.lane.b32.xlu0 %v2461_v37, %s3763_s17  ;;  %v2743_v37 = vld [vmem:[#allocation2 + $0x44] sm:$0x1] }
 0x245   : > { %2586 = vrot.lane.b32.xlu1 %v2564_v19, %s3766_s18  ;;  %v2438_v19 = vunpack.c.l.b16 %v2376_v17  ;;  %v2807_v26 = vunpack.c.l.b16 %v2743_v37  ;;  %v4685_v17 = vld [vmem:[#allocation2 + $0x54] sm:$0xff]  ;;  %v2211_v37 = vrot.slane %v4567_v25, 1 }
 0x246   : > { %v2883_v43 = vshll.u32 %v4685_v17, 16 }
 0x247   : > { %v4662_v45 = vpack.c.b16 %v2438_v19, %v2438_v19  ;;  %v4671_v50 = vpack.c.b16 %v2807_v26, %v2807_v26  ;;  %v2212_v19 = vrot.slane %v4574_v0, 1  ;;  %v4696_v26 = vld [vmem:[#allocation2] sm:$0xff] }
 0x249   : > { %v2506_v28 = vshll.u32 %v4662_v45, 16  ;;  %v2213_v61 = vsel %vm520_vm1, %v2211_v37, %v2212_v19  ;;  %v2825_v37 = vrot.slane %v2823_v13, 1  ;;  %v2828_v19 = vshll.u32 %v4613_v16, 16 }
 0x24b   : > { %v2508_v30 = vrot.slane %v2506_v28, 1 }
 0x24c   : > { %2956 = vrot.lane.b32.xlu0 %v2934_v56, %s3766_s18  ;;  %v2746_v56 = vld [vmem:[#allocation2 + $0x50] sm:$0x1] }
 0x24d   : > { %2548 = vrot.lane.b32.xlu1 %v2473_v53, %s3763_s17  ;;  %v2156_v53 = vor.u32 %v2155_v36, %v2151_v34  ;;  %v2808_v55 = vunpack.c.l.b16 %v2746_v56  ;;  %v2509_v49 = vsel %vm379_vm0, %v2504_v33, %v2508_v30  ;;  %v2881_v36 = vshrl.u32 %v4685_v17, 16 }
 0x24f   : > { %v2161_v63 = vsel %vm379_vm0, %v2156_v53, %v2160_v1  ;;  %v2885_v1 = vrot.slane %v2883_v43, 1  ;;  %v2888_v53 = vshll.u32 %v4692_v38, 16 }
 0x250   : > { %2186 = vrot.lane.b32.xlu2 %v2161_v63, %s3763_s17 }
 0x251   : > { %v2886_v63 = vor.u32 %v2885_v1, %v2881_v36  ;;  %v2890_v23 = vrot.slane %v2888_v53, 1  ;;  %v4734_v1 = vld [vmem:[#allocation2 + $0x54] sm:$0xff] }
 0x252   : > { %v3548_v53 = vld [vmem:[%s5074_s3 + $0x14] sm:$0xf] }
 0x254   : > { %2918 = vrot.lane.b32.xlu0 %v2843_v5, %s3763_s17  ;;  %v2942_v5 = vrot.slane %v4671_v50, 1 }
 0x255   : > { %2958 = vrot.lane.b32.xlu1 %v2937_v6, %s3766_s18  ;;  %v2816_v6 = vpack.c.b16 %v2808_v55, %v2808_v55  ;;  %v2081_v55 = vshll.u32 %v4696_v26, 16 }
 0x256   : > { %v2943_v57 = vsel %vm520_vm1, %v2941_v62, %v2942_v5  ;;  %v2752_v5 = vld [vmem:[#allocation2 + $0x68] sm:$0x1] }
 0x257   : > { %v2876_v31 = vshll.u32 %v2816_v6, 16  ;;  %v2945_v27 = vrot.slane %v2816_v6, 1  ;;  %v2079_v6 = vshrl.u32 %v4696_v26, 16  ;;  %v2083_v33 = vrot.slane %v2081_v55, 1 }
 0x258   : > { %2228 = vrot.lane.b32.xlu2 %v2213_v61, %s3766_s18  ;;  %v2643_v55 = vunpack.c.l.b16 %v3548_v53 }
 0x259   : > { %v2878_v3 = vrot.slane %v2876_v31, 1  ;;  %v2946_v0 = vsel %vm520_vm1, %v2944_v18, %v2945_v27  ;;  %v2382_v31 = vld [vmem:[#allocation2 + $0x5c] sm:$0x1]  ;;  %v2190_v18 = vrot.slane %v4696_v26, 1 }
 0x25b   : > { %v2879_v20 = vsel %vm379_vm0, %v2874_v22, %v2878_v3  ;;  %v2084_v22 = vor.u32 %v2083_v33, %v2079_v6 }
 0x25c   : > { %2590 = vrot.lane.b32.xlu0 %v2570_v8, %s3766_s18  ;;  %v2439_v8 = vunpack.c.l.b16 %v2379_v10  ;;  %v2810_v10 = vunpack.c.l.b16 %v2752_v5  ;;  %v2580_v5 = vrot.slane %v4734_v1, 1 }
 0x25d   : > { %2920 = vrot.lane.b32.xlu1 %v2855_v15, %s3763_s17  ;;  %v1992_v15 = vld [vmem:[#allocation2 + $0x8] sm:$0x1] }
 0x25e   : > { %v2062_v34 = vunpack.c.l.b16 %v1992_v15  ;;  %v4702_v56 = vpack.c.b16 %v2439_v8, %v2439_v8  ;;  %v2440_v8 = vunpack.c.l.b16 %v2382_v31  ;;  %v2821_v15 = vshrl.u32 %v4611_v58, 16 }
 0x25f   : > { %v4730_v43 = vpack.c.b16 %v2810_v10, %v2810_v10 }
 0x260   : > { %v2578_v28 = vrot.slane %v4702_v56, 1  ;;  %v4739_v16 = vpack.c.b16 %v2440_v8, %v2440_v8 }
 0x262   : > { %v2579_v35 = vsel %vm520_vm1, %v2577_v47, %v2578_v28  ;;  %v2581_v6 = vrot.slane %v4739_v16, 1 }
 0x264   : > { %2552 = vrot.lane.b32.xlu0 %v2497_v40, %s3763_s17  ;;  %v2265_v40 = vld [vmem:[%s5074_s3 + $0x8] sm:$0xf] }
 0x265   : > { %2592 = vrot.lane.b32.xlu1 %v2573_v29, %s3766_s18  ;;  %v2070_v29 = vpack.c.b16 %v2062_v34, %v2062_v34  ;;  %v2271_v52 = vunpack.c.l.b16 %v2265_v40  ;;  %v1995_v34 = vld [vmem:[#allocation2 + $0x14] sm:$0x1]  ;;  %v4741_v40 = vld [vmem:[#allocation2 + $0xc] sm:$0xff] }
 0x266   : > { %v2091_v31 = vshrl.u32 %v4741_v40, 16 }
 0x267   : > { %v2273_v62 = vpack.c.b16 %v2271_v52, %v2271_v52  ;;  %v2086_v30 = vshll.u32 %v2070_v29, 16  ;;  %v2191_v27 = vrot.slane %v2070_v29, 1  ;;  %v2063_v29 = vunpack.c.l.b16 %v1995_v34 }
 0x269   : > { %v2294_v32 = vsel %vm2292_vm11, %v2273_v62, 0  ;;  %v2088_v3 = vrot.slane %v2086_v30, 1  ;;  %v2192_v47 = vsel %vm520_vm1, %v2190_v18, %v2191_v27  ;;  %v2645_v62 = vpack.c.b16 %v2643_v55, %v2643_v55 }
 0x26a   : > { %3671 = vmatpush.bf16.msra.mxu3 %v2294_v32  ;;  %2302 = vmatpush.bf16.msrb.mxu2 %v2294_v32  ;;  %v2071_v33 = vpack.c.b16 %v2063_v29, %v2063_v29  ;;  %v2093_v30 = vshll.u32 %v4741_v40, 16  ;;  %v2566_v18 = vrot.slane %v4606_v51, 1  ;;  %v2475_v27 = vshrl.u32 %v4639_v42, 16 }
 0x26b   : > { %v2089_v36 = vsel %vm379_vm0, %v2084_v22, %v2088_v3  ;;  %v2664_v32 = vsel %vm2292_vm11, %v2645_v62, 0  ;;  %v2938_v62 = vrot.slane %v4628_v2, 1 }
 0x26c   : > { %2962 = vrot.lane.b32.xlu0 %v2943_v57, %s3766_s18  ;;  %v2891_v57 = vsel %vm379_vm0, %v2886_v63, %v2890_v23  ;;  %v2900_v23 = vshll.u32 %v4730_v43, 16  ;;  %v2095_v10 = vrot.slane %v2093_v30, 1  ;;  %v2098_v13 = vshll.u32 %v2071_v33, 16 }
 0x26d   : > { %2554 = vrot.lane.b32.xlu1 %v2509_v49, %s3763_s17  ;;  %v4722_v49 = vld [vmem:[#allocation2 + $0x60] sm:$0xff] }
 0x26e   : > { %3672 = vmatpush.bf16.msra.mxu3 %v3651_v4  ;;  %v2895_v61 = vshll.u32 %v4722_v49, 16  ;;  %2303 = vmatpush.bf16.msrb.mxu2 %v3651_v4  ;;  %v2893_v28 = vshrl.u32 %v4722_v49, 16  ;;  %v2902_v4 = vrot.slane %v2900_v23, 1  ;;  %v2096_v3 = vor.u32 %v2095_v10, %v2091_v31 }
 0x26f   : > { %v2100_v8 = vrot.slane %v2098_v13, 1 }
 0x270   : > { %v2897_v63 = vrot.slane %v2895_v61, 1  ;;  %v2477_v61 = vshll.u32 %v4639_v42, 16 }
 0x271   : > { %v2101_v34 = vsel %vm379_vm0, %v2096_v3, %v2100_v8  ;;  %v3660_v3 = vld [vmem:[%s5074_s3 + $0xc] sm:$0xff] }
 0x272   : > { %2672 = vmatpush.bf16.msrb.mxu3 %v2664_v32  ;;  %v2479_v53 = vrot.slane %v2477_v61, 1  ;;  %v2859_v32 = vshll.u32 %v4669_v54, 16 }
 0x274   : > { %2924 = vrot.lane.b32.xlu0 %v2879_v20, %s3763_s17  ;;  %v2826_v20 = vor.u32 %v2825_v37, %v2821_v15  ;;  %v2193_v15 = vrot.slane %v4741_v40, 1  ;;  %v2194_v37 = vrot.slane %v2071_v33, 1  ;;  %v2480_v29 = vor.u32 %v2479_v53, %v2475_v27 }
 0x275   : > { %2964 = vrot.lane.b32.xlu1 %v2946_v0, %s3766_s18  ;;  %v2830_v0 = vrot.slane %v2828_v19, 1  ;;  %v2565_v19 = vrot.slane %v4600_v9, 1  ;;  %v2513_v53 = vshll.u32 %v4700_v12, 16 }
 0x276   : > { %2673 = vmatpush.bf16.msrb.mxu3 %v3660_v3 }
 0x277   : > { %v2831_v52 = vsel %vm379_vm0, %v2826_v20, %v2830_v0  ;;  %v2482_v20 = vshll.u32 %v4641_v41, 16  ;;  %v2195_v0 = vsel %vm520_vm1, %v2193_v15, %v2194_v37 }
 0x278   : > { %2916 = vrot.lane.b32.xlu2 %v2831_v52, %s3763_s17 }
 0x279   : > { %v2484_v55 = vrot.slane %v2482_v20, 1 }
 0x27c   : > { %2596 = vrot.lane.b32.xlu0 %v2579_v35, %s3766_s18  ;;  %v2898_v35 = vor.u32 %v2897_v63, %v2893_v28 }
 0x27d   : > { %2926 = vrot.lane.b32.xlu1 %v2891_v57, %s3763_s17  ;;  %v2582_v57 = vsel %vm520_vm1, %v2580_v5, %v2581_v6  ;;  %v2939_v5 = vrot.slane %v4633_v59, 1 }
 0x27e   : > { %v2903_v22 = vsel %vm379_vm0, %v2898_v35, %v2902_v4  ;;  %v2857_v35 = vshrl.u32 %v4669_v54, 16  ;;  %v2861_v4 = vrot.slane %v2859_v32, 1  ;;  %v3595_v32 = vld [vmem:[%s5074_s3 + $0x20] sm:$0xf] }
 0x27f   : > { %v2940_v6 = vsel %vm520_vm1, %v2938_v62, %v2939_v5  ;;  %v2947_v5 = vrot.slane %v4685_v17, 1 }
 0x280   : > { %v2862_v13 = vor.u32 %v2861_v4, %v2857_v35  ;;  %v2530_v35 = vshll.u32 %v4739_v16, 16  ;;  %v2755_v4 = vld [vmem:[#allocation2 + $0x74] sm:$0x1] }
 0x284   : > { %2174 = vrot.lane.b32.xlu0 %v2089_v36, %s3763_s17  ;;  %v2567_v36 = vsel %vm520_vm1, %v2565_v19, %v2566_v18 }
 0x285   : > { %2214 = vrot.lane.b32.xlu1 %v2192_v47, %s3766_s18  ;;  %2588 = vrot.lane.b32.xlu2 %v2567_v36, %s3766_s18  ;;  %v2485_v47 = vsel %vm379_vm0, %v2480_v29, %v2484_v55  ;;  %v2511_v36 = vshrl.u32 %v4700_v12, 16  ;;  %v2518_v29 = vshll.u32 %v4702_v56, 16  ;;  %v2515_v55 = vrot.slane %v2513_v53, 1  ;;  %v3669_v53 = vld [vmem:[%s5074_s3 + $0x18] sm:$0xff] }
 0x286   : > { %v2183_v8 = vpop.permute.xlu2 %2182 }
 0x287   : > { %v2239_v18 = vsel %vm592_vm4, %v4571_v21, %v2183_v8  ;;  %v2532_v8 = vrot.slane %v2530_v35, 1  ;;  %v2951_v35 = vrot.slane %v4730_v43, 1 }
 0x28c   : > { %2598 = vrot.lane.b32.xlu0 %v2582_v57, %s3766_s18  ;;  %v2864_v57 = vshll.u32 %v4671_v50, 16 }
 0x28d   : > { %2928 = vrot.lane.b32.xlu1 %v2903_v22, %s3763_s17  ;;  %2550 = vrot.lane.b32.xlu2 %v2485_v47, %s3763_s17 }
 0x28e   : > { %v2866_v22 = vrot.slane %v2864_v57, 1  ;;  %v2223_v27 = vpop.permute.xlu2 %2222 }
 0x294   : > { %2176 = vrot.lane.b32.xlu0 %v2101_v34, %s3763_s17  ;;  %v2256_v34 = vsel %vm2246_vm12, %v2239_v18, %v2223_v27 }
 0x295   : > { %2216 = vrot.lane.b32.xlu1 %v2195_v0, %s3766_s18  ;;  %2960 = vrot.lane.b32.xlu2 %v2940_v6, %s3766_s18  ;;  %v2574_v0 = vrot.slane %v4654_v24, 1  ;;  %v2948_v6 = vrot.slane %v4692_v38, 1 }
 0x296   : > { %v2179_v51 = vpop.permute.xlu0 %2178 }
 0x297   : > { %v2181_v52 = vpop.permute.xlu1 %2180  ;;  %v2235_v41 = vsel %vm592_vm4, %v4547_v60, %v2179_v51  ;;  %v2520_v51 = vrot.slane %v2518_v29, 1  ;;  %v2949_v57 = vsel %vm520_vm1, %v2947_v5, %v2948_v6  ;;  %v4853_v29 = vld [vmem:[#allocation2 + $0x60] sm:$0xff] }
 0x298   : > { %v2237_v60 = vsel %vm592_vm4, %v4549_v14, %v2181_v52  ;;  %v2867_v14 = vsel %vm379_vm0, %v2862_v13, %v2866_v22  ;;  %v2516_v52 = vor.u32 %v2515_v55, %v2511_v36 }
 0x29d   : > { %2922 = vrot.lane.b32.xlu2 %v2867_v14, %s3763_s17 }
 0x29e   : > { %v2219_v28 = vpop.permute.xlu0 %2218 }
 0x29f   : > { %v2252_v63 = vsel %vm2246_vm12, %v2235_v41, %v2219_v28  ;;  %v2221_v23 = vpop.permute.xlu1 %2220  ;;  %v2521_v28 = vsel %vm379_vm0, %v2516_v52, %v2520_v51  ;;  %v2583_v52 = vrot.slane %v4853_v29, 1 }
 0x2a0   : > { %3508 = vmatmul.msk.bf16.vlgmr.msra.gmra.mxu3 %vm2275_vm13, %v2252_v63  ;;  %v2254_v59 = vsel %vm2246_vm12, %v2237_v60, %v2221_v23  ;;  %v2523_v60 = vshrl.u32 %v4734_v1, 16 }
 0x2a6   : > { %v2185_v33 = vpop.permute.xlu0 %2184 }
 0x2a7   : > { %v2225_v30 = vpop.permute.xlu1 %2224 }
 0x2aa   : > { %v2187_v63 = vpop.permute.xlu2 %2186 }
 0x2ae   : > { %v4786_v31 = vpop.permute.xlu0 %2226 }
 0x2af   : > { %v4789_v10 = vpop.permute.xlu1 %2188 }
 0x2b0   : > { %3509 = vmatmul.msk.bf16.gmra.mxu3 %vm2275_vm13, %v2254_v59  ;;  %v2811_v59 = vunpack.c.l.b16 %v2755_v4  ;;  %v2245_v43 = vsel %vm592_vm4, %v4567_v25, %v4789_v10 }
 0x2b2   : > { %v2229_v14 = vpop.permute.xlu2 %2228 }
 0x2b6   : > { %v2547_v50 = vpop.permute.xlu0 %2546 }
 0x2b7   : > { %v2603_v15 = vsel %vm592_vm4, %v4585_v44, %v2547_v50  ;;  %v2587_v37 = vpop.permute.xlu1 %2586  ;;  %v2575_v44 = vrot.slane %v4662_v45, 1  ;;  %v2241_v45 = vsel %vm592_vm4, %v4555_v7, %v2185_v33  ;;  %v4836_v7 = vld [vmem:[#allocation2 + $0x6c] sm:$0xff]  ;;  %v3013_v33 = vunpack.c.l.b16 %v3595_v32 }
 0x2b8   : > { %v4800_v19 = vsel %vm2246_vm12, %v2603_v15, %v2587_v37  ;;  %v2258_v56 = vsel %vm2246_vm12, %v2241_v45, %v2225_v30  ;;  %v2525_v30 = vshll.u32 %v4734_v1, 16  ;;  %v2905_v13 = vshrl.u32 %v4836_v7, 16  ;;  %v2385_v37 = vld [vmem:[#allocation2 + $0x68] sm:$0x1] }
 0x2b9   : > { %v2576_v21 = vsel %vm520_vm1, %v2574_v0, %v2575_v44  ;;  %v2907_v38 = vshll.u32 %v4836_v7, 16  ;;  %v3015_v22 = vpack.c.b16 %v3013_v33, %v3013_v33  ;;  %v2819_v50 = vpack.c.b16 %v2811_v59, %v2811_v59 }
 0x2ba   : > { %2594 = vrot.lane.b32.xlu2 %v2576_v21, %s3766_s18  ;;  %v2527_v3 = vrot.slane %v2525_v30, 1  ;;  %v2441_v27 = vunpack.c.l.b16 %v2385_v37  ;;  %v2243_v45 = vsel %vm592_vm4, %v4580_v39, %v2187_v63  ;;  %v2950_v30 = vrot.slane %v4722_v49, 1 }
 0x2bb   : > { %v2909_v15 = vrot.slane %v2907_v38, 1  ;;  %v3034_v18 = vsel %vm2292_vm11, %v3015_v22, 0  ;;  %v2912_v44 = vshll.u32 %v2819_v50, 16  ;;  %v2260_v32 = vsel %vm2246_vm12, %v2243_v45, %v4786_v31 }
 0x2bc   : > { %v2528_v16 = vor.u32 %v2527_v3, %v2523_v60  ;;  %3042 = vmatpush.bf16.msrb.mxu0 %v3034_v18  ;;  %v2449_v21 = vpack.c.b16 %v2441_v27, %v2441_v27  ;;  %v2952_v4 = vsel %vm520_vm1, %v2950_v30, %v2951_v35  ;;  %v2262_v37 = vsel %vm2246_vm12, %v2245_v43, %v2229_v14 }
 0x2bd   : > { %v2910_v0 = vor.u32 %v2909_v15, %v2905_v13  ;;  %v2914_v51 = vrot.slane %v2912_v44, 1  ;;  %v2954_v25 = vrot.slane %v2819_v50, 1 }
 0x2be   : > { %v4804_v61 = vpop.permute.xlu0 %2956  ;;  %v2533_v55 = vsel %vm379_vm0, %v2528_v16, %v2532_v8  ;;  %v2542_v13 = vshll.u32 %v2449_v21, 16 }
 0x2bf   : > { %v4807_v20 = vpop.permute.xlu1 %2548 }
 0x2c0   : > { %3510 = vmatmul.msk.bf16.gmra.mxu3 %vm2275_vm13, %v2256_v34  ;;  %3043 = vmatpush.bf16.msrb.mxu0 %v3669_v53  ;;  %v2544_v3 = vrot.slane %v2542_v13, 1 }
 0x2c2   : > { %2556 = vrot.lane.b32.xlu2 %v2521_v28, %s3763_s17  ;;  %v2584_v28 = vrot.slane %v2449_v21, 1 }
 0x2c4   : > { %v2585_v5 = vsel %vm520_vm1, %v2583_v52, %v2584_v28 }
 0x2c5   : > { %2600 = vrot.lane.b32.xlu0 %v2585_v5, %s3766_s18 }
 0x2c6   : > { %v4817_v47 = vpop.permute.xlu0 %2918 }
 0x2c7   : > { %v4819_v41 = vpop.permute.xlu1 %2958  ;;  %v2975_v38 = vsel %vm592_vm4, %v4615_v46, %v4817_v47  ;;  %v2953_v46 = vrot.slane %v4836_v7, 1 }
 0x2c8   : > { %v2991_v15 = vsel %vm2246_vm12, %v2975_v38, %v4819_v41 }
 0x2c9   : > { %v2955_v10 = vsel %vm520_vm1, %v2953_v46, %v2954_v25 }
 0x2ca   : > { %2966 = vrot.lane.b32.xlu2 %v2949_v57, %s3766_s18 }
 0x2ce   : > { %v4826_v23 = vpop.permute.xlu0 %2590 }
 0x2cf   : > { %v4828_v62 = vpop.permute.xlu1 %2920 }
 0x2d0   : > { %3511 = vmatmul.msk.bf16.gmra.mxu3 %vm2275_vm13, %v2258_v56  ;;  %v2915_v56 = vsel %vm379_vm0, %v2910_v0, %v2914_v51  ;;  %v2977_v53 = vsel %vm592_vm4, %v4628_v2, %v4828_v62  ;;  %v2605_v62 = vsel %vm592_vm4, %v4600_v9, %v4807_v20 }
 0x2d1   : > { %2930 = vrot.lane.b32.xlu1 %v2915_v56, %s3763_s17 }
 0x2d2   : > { %2558 = vrot.lane.b32.xlu2 %v2533_v55, %s3763_s17  ;;  %v2917_v6 = vpop.permute.xlu2 %2916 }
 0x2d3   : > { %v2973_v33 = vsel %vm592_vm4, %v4611_v58, %v2917_v6  ;;  %v2537_v58 = vshll.u32 %v4853_v29, 16 }
 0x2d4   : > { %v2989_v39 = vsel %vm2246_vm12, %v2973_v33, %v4804_v61  ;;  %v2535_v61 = vshrl.u32 %v4853_v29, 16 }
 0x2d5   : > { %3600 = vmatmul.msk.bf16.vlgmr.msrb.gmra.mxu0 %vm2275_vm13, %v2989_v39  ;;  %v2539_v59 = vrot.slane %v2537_v58, 1 }
 0x2d6   : > { %v4846_v34 = vpop.permute.xlu0 %2552 }
 0x2d7   : > { %v4848_v36 = vpop.permute.xlu1 %2592  ;;  %v2540_v22 = vor.u32 %v2539_v59, %v2535_v61  ;;  %v2609_v2 = vsel %vm592_vm4, %v4636_v48, %v4846_v34 }
 0x2d9   : > { %v2545_v8 = vsel %vm379_vm0, %v2540_v22, %v2544_v3 }
 0x2da   : > { %2968 = vrot.lane.b32.xlu2 %v2952_v4, %s3766_s18 }
 0x2de   : > { %v2963_v60 = vpop.permute.xlu0 %2962 }
 0x2df   : > { %v4870_v63 = vpop.permute.xlu1 %2554  ;;  %v2589_v18 = vpop.permute.xlu2 %2588 }
 0x2e0   : > { %3512 = vmatmul.msk.bf16.gmra.mxu3 %vm2275_vm13, %v2260_v32  ;;  %v2621_v5 = vsel %vm2246_vm12, %v2605_v62, %v2589_v18  ;;  %v2611_v30 = vsel %vm592_vm4, %v4654_v24, %v4870_v63 }
 0x2e2   : > { %2560 = vrot.lane.b32.xlu2 %v2545_v8, %s3763_s17 }
 0x2e5   : > { %3601 = vmatmul.msk.bf16.gmra.mxu0 %vm2275_vm13, %v2991_v15 }
 0x2e6   : > { %v2925_v31 = vpop.permute.xlu0 %2924 }
 0x2e7   : > { %v2965_v57 = vpop.permute.xlu1 %2964  ;;  %v2551_v47 = vpop.permute.xlu2 %2550  ;;  %v2981_v48 = vsel %vm592_vm4, %v4665_v11, %v2925_v31 }
 0x2e8   : > { %v2607_v9 = vsel %vm592_vm4, %v4639_v42, %v2551_v47  ;;  %v2997_v20 = vsel %vm2246_vm12, %v2981_v48, %v2965_v57 }
 0x2e9   : > { %v2623_v34 = vsel %vm2246_vm12, %v2607_v9, %v4826_v23 }
 0x2ea   : > { %2970 = vrot.lane.b32.xlu2 %v2955_v10, %s3766_s18 }
 0x2ee   : > { %v4891_v16 = vpop.permute.xlu0 %2596 }
 0x2ef   : > { %v2927_v27 = vpop.permute.xlu1 %2926  ;;  %v2961_v21 = vpop.permute.xlu2 %2960 }
 0x2f0   : > { %3513 = vmatmul.msk.bf16.gmra.mxu3 %vm2275_vm13, %v2262_v37  ;;  %v2993_v55 = vsel %vm2246_vm12, %v2977_v53, %v2961_v21  ;;  %v2983_v33 = vsel %vm592_vm4, %v4685_v17, %v2927_v27 }
 0x2f5   : > { %3602 = vmatmul.msk.bf16.gmra.mxu0 %vm2275_vm13, %v2993_v55 }
 0x2f6   : > { %v2175_v0 = vpop.permute.xlu0 %2174 }
 0x2f7   : > { %v2231_v41 = vsel %vm592_vm4, %v4696_v26, %v2175_v0  ;;  %v2215_v14 = vpop.permute.xlu1 %2214  ;;  %v2923_v56 = vpop.permute.xlu2 %2922  ;;  %v4994_v0 = vld [vmem:[%s5075_s4] ss:$0 sm:$0xff] }
 0x2f8   : > { %v2248_v44 = vsel %vm2246_vm12, %v2231_v41, %v2215_v14 }
 0x2f9   : > { %3506 = vmatmul.msk.bf16.vlgmr.msrb.gmra.mxu2 %vm2275_vm13, %v2248_v44 }
 0x2fe   : > { %v2599_v50 = vpop.permute.xlu0 %2598 }
 0x2ff   : > { %v2929_v51 = vpop.permute.xlu1 %2928 }
 0x300   : > { %3553 = vmatmul.msk.bf16.vlgmr.msrb.gmra.mxu3 %vm2275_vm13, %v4800_v19  ;;  %v2625_v19 = vsel %vm2246_vm12, %v2609_v2, %v4848_v36  ;;  %v2985_v35 = vsel %vm592_vm4, %v4722_v49, %v2929_v51 }
 0x306   : > { %v2177_v26 = vpop.permute.xlu0 %2176 }
 0x307   : > { %v2233_v52 = vsel %vm592_vm4, %v4741_v40, %v2177_v26  ;;  %v2217_v28 = vpop.permute.xlu1 %2216  ;;  %v2979_v40 = vsel %vm592_vm4, %v4669_v54, %v2923_v56 }
 0x308   : > { %v2250_v45 = vsel %vm2246_vm12, %v2233_v52, %v2217_v28  ;;  %v2995_v6 = vsel %vm2246_vm12, %v2979_v40, %v2963_v60 }
 0x309   : > { %3507 = vmatmul.msk.bf16.gmra.mxu2 %vm2275_vm13, %v2250_v45  ;;  %3603 = vmatmul.msk.bf16.gmra.mxu0 %vm2275_vm13, %v2995_v6 }
 0x310   : > { %3554 = vmatmul.msk.bf16.gmra.mxu3 %vm2275_vm13, %v2621_v5 }
 0x314   : > { %v2595_v36 = vpop.permute.xlu2 %2594 }
 0x315   : > { %v2627_v4 = vsel %vm2246_vm12, %v2611_v30, %v2595_v36 }
 0x319   : > { %3604 = vmatmul.msk.bf16.gmra.mxu0 %vm2275_vm13, %v2997_v20 }
 0x31c   : > { %v2557_v32 = vpop.permute.xlu2 %2556 }
 0x31d   : > { %v2613_v24 = vsel %vm592_vm4, %v4700_v12, %v2557_v32 }
 0x31e   : > { %v2629_v49 = vsel %vm2246_vm12, %v2613_v24, %v4891_v16 }
 0x320   : > { %3555 = vmatmul.msk.bf16.gmra.mxu3 %vm2275_vm13, %v2623_v34 }
 0x323   : > { %v4936_v54 = vpop.f32.mrf.mxu3 }
 0x324   : > { %v2967_v60 = vpop.permute.xlu2 %2966 }
 0x325   : > { %v2999_v42 = vsel %vm2246_vm12, %v2983_v33, %v2967_v60  ;;  %v2349_v33 = vadd.f32 %v4994_v0, %v4936_v54 }
 0x329   : > { %3605 = vmatmul.msk.bf16.gmra.mxu0 %vm2275_vm13, %v2999_v42 }
 0x32b   : > { %v4940_v11 = vpop.f32.mrf.mxu3 }
 0x32c   : > { %v2559_v39 = vpop.permute.xlu2 %2558 }
 0x32d   : > { %v2615_v12 = vsel %vm592_vm4, %v4734_v1, %v2559_v39 }
 0x32e   : > { %v2631_v8 = vsel %vm2246_vm12, %v2615_v12, %v2599_v50 }
 0x330   : > { %3556 = vmatmul.msk.bf16.gmra.mxu3 %vm2275_vm13, %v2625_v19 }
 0x333   : > { %v4945_v23 = vpop.f32.mrf.mxu3 }
 0x334   : > { %v2969_v58 = vpop.permute.xlu2 %2968  ;;  %v2351_v54 = vadd.f32 %v4994_v0, %v4945_v23 }
 0x335   : > { %v3001_v31 = vsel %vm2246_vm12, %v2985_v35, %v2969_v58 }
 0x337   : > { %v2601_v18 = vpop.permute.xlu0 %2600 }
 0x339   : > { %3606 = vmatmul.msk.bf16.gmra.mxu0 %vm2275_vm13, %v3001_v31 }
 0x33b   : > { %v4952_v17 = vpop.f32.mrf.mxu3 }
 0x33c   : > { %v2561_v61 = vpop.permute.xlu2 %2560 }
 0x33d   : > { %v2617_v37 = vsel %vm592_vm4, %v4853_v29, %v2561_v61 }
 0x33e   : > { %v2633_v27 = vsel %vm2246_vm12, %v2617_v37, %v2601_v18 }
 0x340   : > { %3557 = vmatmul.msk.bf16.gmra.mxu3 %vm2275_vm13, %v2627_v4  ;;  %v2350_v4 = vadd.f32 %v4994_v0, %v4940_v11  ;;  %v2352_v11 = vadd.f32 %v4994_v0, %v4952_v17 }
 0x343   : > { %v4958_v57 = vpop.f32.mrf.mxu3  ;;  %v2931_v59 = vpop.permute.xlu1 %2930 }
 0x344   : > { %v2987_v13 = vsel %vm592_vm4, %v4836_v7, %v2931_v59  ;;  %v2971_v38 = vpop.permute.xlu2 %2970  ;;  %v2353_v23 = vadd.f32 %v4994_v0, %v4958_v57 }
 0x345   : > { %v3003_v22 = vsel %vm2246_vm12, %v2987_v13, %v2971_v38 }
 0x349   : > { %3607 = vmatmul.msk.bf16.gmra.mxu0 %vm2275_vm13, %v3003_v22 }
 0x34b   : > { %v4962_v63 = vpop.f32.mrf.mxu3 }
 0x34c   : > { %v2354_v17 = vadd.f32 %v4994_v0, %v4962_v63 }
 0x350   : > { %3558 = vmatmul.msk.bf16.gmra.mxu3 %vm2275_vm13, %v2629_v49 }
 0x352   : > { %v3045_v7 = vpop.f32.mrf.mxu0 }
 0x353   : > { %v4971_v3 = vpop.f32.mrf.mxu3 }
 0x354   : > { %v2355_v57 = vadd.f32 %v4994_v0, %v4971_v3 }
 0x35a   : > { %v3047_v1 = vpop.f32.mrf.mxu0 }
 0x35b   : > { %v4975_v43 = vpop.f32.mrf.mxu3 }
 0x35c   : > { %v2356_v63 = vadd.f32 %v4994_v0, %v4975_v43 }
 0x360   : > { %3559 = vmatmul.msk.bf16.gmra.mxu3 %vm2275_vm13, %v2631_v8 }
 0x362   : > { %v3050_v10 = vpop.f32.mrf.mxu0 }
 0x363   : > { %v4979_v15 = vpop.f32.mrf.mxu3 }
 0x364   : > { %v2357_v3 = vadd.f32 %v4994_v0, %v4979_v15 }
 0x36a   : > { %v3052_v53 = vpop.f32.mrf.mxu0 }
 0x36b   : > { %v4983_v16 = vpop.f32.mrf.mxu3 }
 0x36c   : > { %v2358_v43 = vadd.f32 %v4994_v0, %v4983_v16 }
 0x370   : > { %3560 = vmatmul.msk.bf16.gmra.mxu3 %vm2275_vm13, %v2633_v27 }
 0x372   : > { %v3055_v45 = vpop.f32.mrf.mxu0 }
 0x373   : > { %v4987_v46 = vpop.f32.mrf.mxu3 }
 0x374   : > { %v2359_v15 = vadd.f32 %v4994_v0, %v4987_v46 }
 0x37a   : > { %v3057_v9 = vpop.f32.mrf.mxu0 }
 0x37b   : > { %v4989_v25 = vpop.f32.mrf.mxu3 }
 0x37c   : > { %v2305_v47 = vpop.f32.mrf.mxu2  ;;  %v2360_v16 = vadd.f32 %v4994_v0, %v4989_v25 }
 0x37d   : > { %v2345_v29 = vadd.f32 %v4994_v0, %v2305_v47 }
 0x383   : > { %v2675_v41 = vpop.f32.mrf.mxu3 }
 0x384   : > { %v2715_v14 = vadd.f32 %v2675_v41, %v2345_v29  ;;  %v2307_v44 = vpop.f32.mrf.mxu2 }
 0x385   : > { %v2346_v55 = vadd.f32 %v4994_v0, %v2307_v44 }
 0x386   : > { %v3085_v21 = vadd.f32 %v3045_v7, %v2715_v14  ;;  %v3060_v42 = vpop.f32.mrf.mxu0 }
 0x388   : > { %v3101_v50 = vmax.f32 %v3085_v21, 0.0 }
 0x38a   : > { %3117 = vst.msk [vmem:[%s3847_s15] sm:$0xff] %vm571_vm3, %v3101_v50 }
 0x38b   : > { %v2677_v51 = vpop.f32.mrf.mxu3 }
 0x38c   : > { %v2716_v26 = vadd.f32 %v2677_v51, %v2346_v55  ;;  %v2310_v52 = vpop.f32.mrf.mxu2 }
 0x38d   : > { %v2347_v62 = vadd.f32 %v4994_v0, %v2310_v52 }
 0x38e   : > { %v3086_v28 = vadd.f32 %v3047_v1, %v2716_v26  ;;  %v3062_v61 = vpop.f32.mrf.mxu0 }
 0x390   : > { %v3102_v2 = vmax.f32 %v3086_v28, 0.0 }
 0x392   : > { %3118 = vst.msk [vmem:[%s3847_s15 + $0x8] sm:$0xff] %vm571_vm3, %v3102_v2 }
 0x393   : > { %v2680_v56 = vpop.f32.mrf.mxu3 }
 0x394   : > { %v2717_v19 = vadd.f32 %v2680_v56, %v2347_v62  ;;  %v2312_v5 = vpop.f32.mrf.mxu2 }
 0x395   : > { %v2348_v48 = vadd.f32 %v4994_v0, %v2312_v5 }
 0x396   : > { %v3087_v40 = vadd.f32 %v3050_v10, %v2717_v19  ;;  %v3065_v22 = vpop.f32.mrf.mxu0 }
 0x398   : > { %v3103_v6 = vmax.f32 %v3087_v40, 0.0 }
 0x39a   : > { %3119 = vst.msk [vmem:[%s3847_s15 + $0x10] sm:$0xff] %vm571_vm3, %v3103_v6 }
 0x39b   : > { %v2682_v20 = vpop.f32.mrf.mxu3 }
 0x39c   : > { %v2718_v34 = vadd.f32 %v2682_v20, %v2348_v48 }
 0x39e   : > { %v3088_v36 = vadd.f32 %v3052_v53, %v2718_v34  ;;  %v3067_v27 = vpop.f32.mrf.mxu0 }
 0x3a0   : > { %v3104_v32 = vmax.f32 %v3088_v36, 0.0 }
 0x3a2   : > { %3120 = vst.msk [vmem:[%s3847_s15 + $0x18] sm:$0xff] %vm571_vm3, %v3104_v32 }
 0x3a3   : > { %v2685_v60 = vpop.f32.mrf.mxu3 }
 0x3a4   : > { %v2719_v39 = vadd.f32 %v2685_v60, %v2349_v33 }
 0x3a6   : > { %v3089_v30 = vadd.f32 %v3055_v45, %v2719_v39  ;;  %v3070_v14 = vpop.f32.mrf.mxu0 }
 0x3a8   : > { %v3105_v35 = vmax.f32 %v3089_v30, 0.0 }
 0x3aa   : > { %3121 = vst.msk [vmem:[%s3847_s15 + $0x20] sm:$0xff] %vm571_vm3, %v3105_v35 }
 0x3ab   : > { %v2687_v58 = vpop.f32.mrf.mxu3 }
 0x3ac   : > { %v2720_v31 = vadd.f32 %v2687_v58, %v2350_v4 }
 0x3ae   : > { %v3090_v24 = vadd.f32 %v3057_v9, %v2720_v31  ;;  %v3072_v51 = vpop.f32.mrf.mxu0 }
 0x3b0   : > { %v3106_v49 = vmax.f32 %v3090_v24, 0.0 }
 0x3b2   : > { %3122 = vst.msk [vmem:[%s3847_s15 + $0x28] sm:$0xff] %vm571_vm3, %v3106_v49 }
 0x3b3   : > { %v2690_v59 = vpop.f32.mrf.mxu3 }
 0x3b4   : > { %v2721_v13 = vadd.f32 %v2690_v59, %v2351_v54 }
 0x3b6   : > { %v3091_v38 = vadd.f32 %v3060_v42, %v2721_v13  ;;  %v3075_v62 = vpop.f32.mrf.mxu0 }
 0x3b8   : > { %v3107_v12 = vmax.f32 %v3091_v38, 0.0 }
 0x3ba   : > { %3123 = vst.msk [vmem:[%s3847_s15 + $0x30] sm:$0xff] %vm571_vm3, %v3107_v12 }
 0x3bb   : > { %v2692_v8 = vpop.f32.mrf.mxu3 }
 0x3bc   : > { %v2722_v7 = vadd.f32 %v2692_v8, %v2352_v11 }
 0x3be   : > { %v3092_v37 = vadd.f32 %v3062_v61, %v2722_v7  ;;  %v3077_v48 = vpop.f32.mrf.mxu0 }
 0x3c0   : > { %v3108_v18 = vmax.f32 %v3092_v37, 0.0 }
 0x3c2   : > { %3124 = vst.msk [vmem:[%s3847_s15 + $0x38] sm:$0xff] %vm571_vm3, %v3108_v18 }
 0x3c3   : > { %v2695_v1 = vpop.f32.mrf.mxu3 }
 0x3c4   : > { %v2723_v10 = vadd.f32 %v2695_v1, %v2353_v23 }
 0x3c6   : > { %v3093_v47 = vadd.f32 %v3065_v22, %v2723_v10  ;;  %v3080_v32 = vpop.f32.mrf.mxu0 }
 0x3c8   : > { %v3109_v29 = vmax.f32 %v3093_v47, 0.0 }
 0x3ca   : > { %3125 = vst.msk [vmem:[%s3847_s15 + $0x40] sm:$0xff] %vm571_vm3, %v3109_v29 }
 0x3cb   : > { %v2697_v41 = vpop.f32.mrf.mxu3 }
 0x3cc   : > { %v2724_v44 = vadd.f32 %v2697_v41, %v2354_v17 }
 0x3ce   : > { %v3094_v53 = vadd.f32 %v3067_v27, %v2724_v44  ;;  %v3082_v4 = vpop.f32.mrf.mxu0 }
 0x3d0   : > { %v3110_v21 = vmax.f32 %v3094_v53, 0.0 }
 0x3d2   : > { %3126 = vst.msk [vmem:[%s3847_s15 + $0x48] sm:$0xff] %vm571_vm3, %v3110_v21 }
 0x3d3   : > { %v2700_v50 = vpop.f32.mrf.mxu3 }
 0x3d4   : > { %v2725_v55 = vadd.f32 %v2700_v50, %v2355_v57 }
 0x3d6   : > { %v3095_v26 = vadd.f32 %v3070_v14, %v2725_v55 }
 0x3d8   : > { %v3111_v52 = vmax.f32 %v3095_v26, 0.0 }
 0x3da   : > { %3127 = vst.msk [vmem:[%s3847_s15 + $0x50] sm:$0xff] %vm571_vm3, %v3111_v52 }
 0x3db   : > { %v2702_v28 = vpop.f32.mrf.mxu3 }
 0x3dc   : > { %v2726_v45 = vadd.f32 %v2702_v28, %v2356_v63 }
 0x3de   : > { %v3096_v2 = vadd.f32 %v3072_v51, %v2726_v45 }
 0x3e0   : > { %v3112_v56 = vmax.f32 %v3096_v2, 0.0 }
 0x3e2   : > { %3128 = vst.msk [vmem:[%s3847_s15 + $0x58] sm:$0xff] %vm571_vm3, %v3112_v56 }
 0x3e3   : > { %v2705_v19 = vpop.f32.mrf.mxu3 }
 0x3e4   : > { %v2727_v5 = vadd.f32 %v2705_v19, %v2357_v3 }
 0x3e6   : > { %v3097_v40 = vadd.f32 %v3075_v62, %v2727_v5 }
 0x3e8   : > { %v3113_v6 = vmax.f32 %v3097_v40, 0.0 }
 0x3ea   : > { %3129 = vst.msk [vmem:[%s3847_s15 + $0x60] sm:$0xff] %vm571_vm3, %v3113_v6 }
 0x3eb   : > { %v2707_v9 = vpop.f32.mrf.mxu3 }
 0x3ec   : > { %v2728_v20 = vadd.f32 %v2707_v9, %v2358_v43 }
 0x3ee   : > { %v3098_v34 = vadd.f32 %v3077_v48, %v2728_v20 }
 0x3f0   : > { %v3114_v36 = vmax.f32 %v3098_v34, 0.0 }
 0x3f2   : > { %3130 = vst.msk [vmem:[%s3847_s15 + $0x68] sm:$0xff] %vm571_vm3, %v3114_v36 }
 0x3f3   : > { %v2710_v33 = vpop.f32.mrf.mxu3 }
 0x3f4   : > { %v2729_v60 = vadd.f32 %v2710_v33, %v2359_v15 }
 0x3f6   : > { %v3099_v42 = vadd.f32 %v3080_v32, %v2729_v60 }
 0x3f8   : > { %v3115_v39 = vmax.f32 %v3099_v42, 0.0 }
 0x3fa   : > { %3131 = vst.msk [vmem:[%s3847_s15 + $0x70] sm:$0xff] %vm571_vm3, %v3115_v39 }
 0x3fb   : > { %v2712_v30 = vpop.f32.mrf.mxu3 }
 0x3fc   : > { %v2730_v35 = vadd.f32 %v2712_v30, %v2360_v16 }
 0x3fe   : > { %v3100_v58 = vadd.f32 %v3082_v4, %v2730_v35 }
 0x400   : > { %v3116_v31 = vmax.f32 %v3100_v58, 0.0 }
 0x402   : > { %3132 = vst.msk [vmem:[%s3847_s15 + $0x78] sm:$0xff] %vm571_vm3, %v3116_v31 }
 0x403 PF: > { %s15_s22 = sadd.s32 1, %s3760_s22   ;;  %s5079_s18 = smov %s3752_s20 }
 0x404   : > { %p12_p10 = scmp.ge.s32.totalorder %s15_s22, 6   ;;  %s5080_s19 = smov %s3756_s21 }
 0x405   : > { %s5081_s20 = smov %s5084_s23  ;;  %s5082_s21 = smov %s5088_s24 }
 0x406   :  { %14 = sbr.rel (!%p12_p10) target bundleno = 3 (0x3), region = 87 }

</bundles_post_ra>
